<compile_context>
chip_gen: v6e
topology: v6e:2x2x1
jax: 0.10.0
libtpu: 0.0.40
codegen_flags: <defaults>
</compile_context>

<pallas_src>
import functools

import jax
import jax.numpy as jnp
from jax.experimental import pallas as pl
from jax.experimental.pallas import tpu as pltpu


def repvgg_kernel(x_ref, wf_ref, bias_ref, o_ref, xcol_ref, *, H, W, C, TH):
    co = pl.program_id(1)

    # ---- kx-folded, zero-padded activation buffer, built once per batch
    # element (it only depends on the batch grid index; co is "arbitrary").
    # Layout: xcol[r, w, kx*C + ci] = xpad[r, w + kx, ci], xpad = 1-px-padded x.
    @pl.when(co == 0)
    def _build_xcol():
        bf = xcol_ref.dtype
        # Zero only the halo strips; the interior is fully overwritten below.
        xcol_ref[0:1] = jnp.zeros((1, W, 3 * C), bf)                 # top row
        xcol_ref[H + 1:H + 2] = jnp.zeros((1, W, 3 * C), bf)         # bottom row
        xcol_ref[1:H + 1, 0:1, 0:C] = jnp.zeros((H, 1, C), bf)       # kx=0 left col
        xcol_ref[1:H + 1, W - 1:W, 2 * C:3 * C] = jnp.zeros((H, 1, C), bf)  # kx=2 right col
        # kx = 1 slot: aligned copy of x.
        xcol_ref[1:H + 1, :, C:2 * C] = x_ref[0]
        # kx = 0 slot: x shifted right by one column (left zero pad).
        xcol_ref[1:H + 1, 1:W, 0:C] = x_ref[0, :, 0:W - 1, :]
        # kx = 2 slot: x shifted left by one column (right zero pad).
        xcol_ref[1:H + 1, 0:W - 1, 2 * C:3 * C] = x_ref[0, :, 1:W, :]

    bias = bias_ref[...].astype(jnp.float32)                         # (1, TCO)
    nchunks = H // TH
    dn = (((2,), (0,)), ((), ()))

    def chunk(c, carry):
        h0 = pl.multiple_of(c * TH, TH)
        # 3x3 conv for TH output rows: 3 MXU contractions with K = 3*Cin.
        # The ky slices move along the free leading axis only; the partial sum
        # stays in a value (vregs / MRB), not a VMEM accumulator ref.
        acc = jax.lax.dot_general(xcol_ref[pl.ds(h0, TH)], wf_ref[0],
                                  dimension_numbers=dn,
                                  preferred_element_type=jnp.float32)
        acc += jax.lax.dot_general(xcol_ref[pl.ds(h0 + 1, TH)], wf_ref[1],
                                   dimension_numbers=dn,
                                   preferred_element_type=jnp.float32)
        acc += jax.lax.dot_general(xcol_ref[pl.ds(h0 + 2, TH)], wf_ref[2],
                                   dimension_numbers=dn,
                                   preferred_element_type=jnp.float32)
        y = acc + bias                                               # (TH, W, TCO) f32
        o_ref[0, pl.ds(h0, TH)] = (y * jax.nn.sigmoid(y)).astype(o_ref.dtype)
        return carry

    jax.lax.fori_loop(0, nchunks, chunk, 0, unroll=nchunks <= 8)


def _round_up(x, m):
    return ((x + m - 1) // m) * m


def _pick_cout_tile(cout_p):
    # Lane-dense output tiles. 256 only helps on chips with a 256-wide MXU
    # (v6e / v7x); v5e and older get no MXU benefit and pay 2x the VMEM.
    wide_mxu = False
    try:
        kind = jax.devices()[0].device_kind.lower()
        wide_mxu = not any(t in kind for t in ("v2", "v3", "v4", "v5"))
    except Exception:
        wide_mxu = False
    if wide_mxu and cout_p % 256 == 0:
        return 256
    return 128


def _pick_row_tile(H, W, tco, budget_bytes=256 * 1024):
    # Largest divisor of H whose f32 chunk accumulator stays under the budget.
    max_rows = max(1, budget_bytes // (W * tco * 4))
    th = 1
    for d in range(1, H + 1):
        if H % d == 0 and d <= max_rows:
            th = d
    return th


def repvgg_forward(x, w3f, bias, out_dtype=jnp.bfloat16):
    """x: (N, H, W, Cin) NHWC; w3f: (3, 3, Cin, Cout) folded; bias: (1, Cout)."""
    N, H, W, Cin = x.shape
    Cout = w3f.shape[-1]

    # Pad Cout to a multiple of 128 so output stores are lane-dense.
    Cout_p = _round_up(Cout, 128)
    TCO = _pick_cout_tile(Cout_p)
    n_co = Cout_p // TCO
    TH = _pick_row_tile(H, W, TCO)

    # Feed the MXU bf16; accumulation stays f32 inside the kernel.
    # TODO(synk): for trained weights with very large BN scales the folded
    # center tap can lose small 3x3 coefficients in bf16; keep the fold in f32
    # (or split the identity/1x1 contribution into an f32 path) if needed.
    x_bf = x.astype(jnp.bfloat16)
    w3_p = jnp.pad(w3f, ((0, 0), (0, 0), (0, 0), (0, Cout_p - Cout)))
    wf = w3_p.reshape(3, 3 * Cin, Cout_p).astype(jnp.bfloat16)   # kx folded into K
    bias_p = jnp.pad(bias, ((0, 0), (0, Cout_p - Cout))).astype(jnp.float32)

    out_itemsize = jnp.dtype(out_dtype).itemsize
    flops = 2 * N * H * W * 9 * Cin * Cout_p
    bytes_accessed = (N * H * W * Cin * 2               # activations (bf16), once per n
                      + N * n_co * 9 * Cin * TCO * 2    # weight tiles per (n, co) step
                      + Cout_p * 4                      # bias
                      + N * H * W * Cout_p * out_itemsize)

    # Per-step VMEM footprint: double-buffered pipeline blocks + scratch.
    footprint = (2 * H * W * Cin * 2                    # x block (bf16)
                 + 2 * H * W * TCO * out_itemsize       # out block
                 + 2 * 9 * Cin * TCO * 2                # weight block (bf16)
                 + 2 * TCO * 4                          # bias block
                 + (H + 2) * W * 3 * Cin * 2)           # im2col scratch (bf16)
    vmem_limit = int(min(64 * 2**20, max(32 * 2**20, int(footprint * 1.7))))

    kernel = functools.partial(repvgg_kernel, H=H, W=W, C=Cin, TH=TH)
    out = pl.pallas_call(
        kernel,
        out_shape=jax.ShapeDtypeStruct((N, H, W, Cout_p), out_dtype),
        grid=(N, n_co),
        in_specs=[
            pl.BlockSpec((1, H, W, Cin), lambda n, co: (n, 0, 0, 0)),
            pl.BlockSpec((3, 3 * Cin, TCO), lambda n, co: (0, 0, co)),
            pl.BlockSpec((1, TCO), lambda n, co: (0, co)),
        ],
        out_specs=pl.BlockSpec((1, H, W, TCO), lambda n, co: (n, 0, 0, co)),
        scratch_shapes=[
            pltpu.VMEM((H + 2, W, 3 * Cin), jnp.bfloat16),   # kx-folded padded act
        ],
        compiler_params=pltpu.CompilerParams(
            # co must be "arbitrary": the xcol scratch built at co==0 is reused
            # by the later co steps of the same batch element on the same core.
            dimension_semantics=("parallel", "arbitrary"),
            vmem_limit_bytes=vmem_limit),
        cost_estimate=pl.CostEstimate(
            flops=flops,
            transcendentals=N * H * W * Cout_p,              # sigmoid
            bytes_accessed=bytes_accessed),
    )(x_bf, wf, bias_p)
    return out[..., :Cout] if Cout_p != Cout else out


def make_raw_params(key, cin, cout):
    ks = jax.random.split(key, 14)
    p = {}
    p["w3"] = jax.random.normal(ks[0], (cout, cin, 3, 3), jnp.float32) * 0.1
    p["w1"] = jax.random.normal(ks[1], (cout, cin, 1, 1), jnp.float32) * 0.1
    # dense-branch BN
    p["g3"] = jax.random.uniform(ks[2], (cout,), minval=0.8, maxval=1.2)
    p["b3"] = jax.random.normal(ks[3], (cout,)) * 0.05
    p["m3"] = jax.random.normal(ks[4], (cout,)) * 0.05
    p["v3"] = jax.random.uniform(ks[5], (cout,), minval=0.5, maxval=1.5)
    # 1x1-branch BN
    p["g1"] = jax.random.uniform(ks[6], (cout,), minval=0.8, maxval=1.2)
    p["b1"] = jax.random.normal(ks[7], (cout,)) * 0.05
    p["m1"] = jax.random.normal(ks[8], (cout,)) * 0.05
    p["v1"] = jax.random.uniform(ks[9], (cout,), minval=0.5, maxval=1.5)
    # identity BN (exists only when cin == cout and stride == 1)
    p["gi"] = jax.random.uniform(ks[10], (cin,), minval=0.8, maxval=1.2)
    p["bi"] = jax.random.normal(ks[11], (cin,)) * 0.05
    p["mi"] = jax.random.normal(ks[12], (cin,)) * 0.05
    p["vi"] = jax.random.uniform(ks[13], (cin,), minval=0.5, maxval=1.5)
    return p


def fuse_params(p, eps=1e-5):
    """Full RepVGG re-parameterization: fold BN of all branches, then fold the
    1x1 branch and the identity branch into the center tap of the 3x3 kernel.
    Returns w3f (3, 3, Cin, Cout) and bias (1, Cout)."""
    cout, cin = p["w3"].shape[0], p["w3"].shape[1]
    s3 = p["g3"] / jnp.sqrt(p["v3"] + eps)
    s1 = p["g1"] / jnp.sqrt(p["v1"] + eps)

    # (Cout, Cin, kh, kw) -> (kh, kw, Cin, Cout), per-out-channel BN scale.
    w3f = jnp.transpose(p["w3"], (2, 3, 1, 0)) * s3            # (3,3,Cin,Cout)
    w1f = jnp.transpose(p["w1"][:, :, 0, 0], (1, 0)) * s1      # (Cin, Cout)
    extra = w1f
    bias = (p["b3"] - p["m3"] * s3) + (p["b1"] - p["m1"] * s1)

    if cin == cout:   # identity BN branch exists (stride == 1, groups == 1)
        si = p["gi"] / jnp.sqrt(p["vi"] + eps)
        extra = extra + jnp.eye(cin, dtype=w3f.dtype) * si     # diag(si)
        bias = bias + (p["bi"] - p["mi"] * si)

    w3f = w3f.at[1, 1].add(extra)                              # center tap fold
    return w3f, bias.reshape(1, cout)


def ref_forward(x, p, eps=1e-5):
    # Pure-JAX branch-wise reference of the eval-mode RepVGG forward (NHWC).
    def bn(y, g, b, m, v):
        return (y - m) * (g / jnp.sqrt(v + eps)) + b

    dn = ("NHWC", "OIHW", "NHWC")
    y3 = jax.lax.conv_general_dilated(x, p["w3"], (1, 1), ((1, 1), (1, 1)),
                                      dimension_numbers=dn)
    y3 = bn(y3, p["g3"], p["b3"], p["m3"], p["v3"])
    y1 = jax.lax.conv_general_dilated(x, p["w1"], (1, 1), ((0, 0), (0, 0)),
                                      dimension_numbers=dn)
    y1 = bn(y1, p["g1"], p["b1"], p["m1"], p["v1"])
    yi = bn(x, p["gi"], p["bi"], p["mi"], p["vi"])
    s = y3 + y1 + yi
    return s * jax.nn.sigmoid(s)


def fused_conv_ref(x, w3f, bias):
    # Pure-JAX reference of the folded form: conv3x3 + bias + SiLU (NHWC, HWIO).
    y = jax.lax.conv_general_dilated(
        x, w3f, (1, 1), ((1, 1), (1, 1)),
        dimension_numbers=("NHWC", "HWIO", "NHWC"))
    y = y + bias.reshape(1, 1, 1, -1)
    return y * jax.nn.sigmoid(y)


if __name__ == "__main__":
    N, C, H, W = 2, 4, 16, 16        # in_channels == out_channels, stride=1
    key = jax.random.PRNGKey(0)
    kx_key, kp_key = jax.random.split(key)

    # PyTorch module takes NCHW; we use NHWC internally (documented layout).
    x_nchw = jax.random.normal(kx_key, (N, C, H, W), jnp.float32)
    x = jnp.transpose(x_nchw, (0, 2, 3, 1))          # -> NHWC

    raw = make_raw_params(kp_key, C, C)
    w3f, bias = fuse_params(raw)

    # 1) Validate the host-side re-parameterization in f32.
    ref = ref_forward(x, raw)
    fused_f32 = fused_conv_ref(x, w3f, bias)
    assert jnp.max(jnp.abs(fused_f32 - ref)) < 1e-4, "re-param fold mismatch"

    # 2) Run the Pallas kernel (bf16 MXU operands, f32 accumulation, bf16 out).
    out = jax.block_until_ready(repvgg_forward(x, w3f, bias))
    assert out.shape == (N, H, W, C)
    assert out.dtype == jnp.bfloat16

    out_f32 = out.astype(jnp.float32)
    # Check against a reference fed the same bf16-rounded operands (output is
    # bf16, so allow ~1 bf16 ULP at the output magnitude).
    ref_bf = fused_conv_ref(
        x.astype(jnp.bfloat16).astype(jnp.float32),
        w3f.astype(jnp.bfloat16).astype(jnp.float32), bias)
    assert jnp.max(jnp.abs(out_f32 - ref_bf)) < 1e-1, "kernel mismatch vs JAX reference"
    # Loose end-to-end sanity check vs the full-precision branch-wise reference.
    assert jnp.max(jnp.abs(out_f32 - ref)) < 2.5e-1, "kernel drifted from f32 reference"

    print("KERNEL_OK")
</pallas_src>

<mosaic_0001>
module attributes {stable_mosaic.version = 11 : i64} {
  func.func @repvgg_kernel(%arg0: i32, %arg1: i32, %arg2: memref<1x16x16x4xbf16, #tpu.memory_space<vmem>>, %arg3: memref<3x12x128xbf16, #tpu.memory_space<vmem>>, %arg4: memref<1x128xf32, #tpu.memory_space<vmem>>, %arg5: memref<1x16x16x128xbf16, #tpu.memory_space<vmem>>, %arg6: memref<18x16x12xbf16, #tpu.memory_space<vmem>>) attributes {dimension_semantics = [#tpu.dimension_semantics<parallel>, #tpu.dimension_semantics<arbitrary>], iteration_bounds = array<i64: 2, 1>, scalar_prefetch = 0 : i64, scratch_operands = 1 : i64, tpu.core_type = #tpu.core_type<tc>, window_params = [{transform_indices = @transform_0, window_bounds = array<i64: 1, 16, 16, 4>}, {transform_indices = @transform_1, window_bounds = array<i64: 3, 12, 128>}, {transform_indices = @transform_2, window_bounds = array<i64: 1, 128>}, {transform_indices = @transform_3, window_bounds = array<i64: 1, 16, 16, 128>}]} {
    %c0_i32 = arith.constant 0 : i32
    %0 = arith.cmpi eq, %arg1, %c0_i32 : i32
    %1 = arith.extui %0 : i1 to i32
    %c0_i32_0 = arith.constant 0 : i32
    %2 = arith.cmpi ne, %1, %c0_i32_0 : i32
    scf.if %2 {
      %cst_23 = arith.constant 0.000000e+00 : bf16
      %39 = vector.broadcast %cst_23 : bf16 to vector<1x16x12xbf16>
      %c0_24 = arith.constant 0 : index
      %c0_25 = arith.constant 0 : index
      %c0_26 = arith.constant 0 : index
      %40 = vector.load %arg6[%c0_24, %c0_25, %c0_26] : memref<18x16x12xbf16, #tpu.memory_space<vmem>>, vector<1x16x12xbf16>
      tpu.vector_store %arg6[%c0_24, %c0_25, %c0_26], %39 {strides = array<i32>} : memref<18x16x12xbf16, #tpu.memory_space<vmem>>, vector<1x16x12xbf16>,
      %cst_27 = arith.constant 0.000000e+00 : bf16
      %41 = vector.broadcast %cst_27 : bf16 to vector<1x16x12xbf16>
      %c17 = arith.constant 17 : index
      %c0_28 = arith.constant 0 : index
      %c0_29 = arith.constant 0 : index
      %42 = vector.load %arg6[%c17, %c0_28, %c0_29] : memref<18x16x12xbf16, #tpu.memory_space<vmem>>, vector<1x16x12xbf16>
      tpu.vector_store %arg6[%c17, %c0_28, %c0_29], %41 {strides = array<i32>} : memref<18x16x12xbf16, #tpu.memory_space<vmem>>, vector<1x16x12xbf16>,
      %cst_30 = arith.constant 0.000000e+00 : bf16
      %43 = vector.broadcast %cst_30 : bf16 to vector<16x1x4xbf16>
      %c1_31 = arith.constant 1 : index
      %c0_32 = arith.constant 0 : index
      %c0_33 = arith.constant 0 : index
      %44 = vector.load %arg6[%c1_31, %c0_32, %c0_33] : memref<18x16x12xbf16, #tpu.memory_space<vmem>>, vector<16x1x4xbf16>
      tpu.vector_store %arg6[%c1_31, %c0_32, %c0_33], %43 {strides = array<i32>} : memref<18x16x12xbf16, #tpu.memory_space<vmem>>, vector<16x1x4xbf16>,
      %cst_34 = arith.constant 0.000000e+00 : bf16
      %45 = vector.broadcast %cst_34 : bf16 to vector<16x1x4xbf16>
      %c1_35 = arith.constant 1 : index
      %c15 = arith.constant 15 : index
      %c8 = arith.constant 8 : index
      %46 = vector.load %arg6[%c1_35, %c15, %c8] : memref<18x16x12xbf16, #tpu.memory_space<vmem>>, vector<16x1x4xbf16>
      tpu.vector_store %arg6[%c1_35, %c15, %c8], %45 {strides = array<i32>} : memref<18x16x12xbf16, #tpu.memory_space<vmem>>, vector<16x1x4xbf16>,
      %c0_36 = arith.constant 0 : index
      %c0_37 = arith.constant 0 : index
      %c0_38 = arith.constant 0 : index
      %c0_39 = arith.constant 0 : index
      %47 = vector.load %arg2[%c0_36, %c0_37, %c0_38, %c0_39] : memref<1x16x16x4xbf16, #tpu.memory_space<vmem>>, vector<1x16x16x4xbf16>
      %48 = vector.shape_cast %47 : vector<1x16x16x4xbf16> to vector<16x16x4xbf16>
      %c1_40 = arith.constant 1 : index
      %c0_41 = arith.constant 0 : index
      %c4 = arith.constant 4 : index
      %49 = vector.load %arg6[%c1_40, %c0_41, %c4] : memref<18x16x12xbf16, #tpu.memory_space<vmem>>, vector<16x16x4xbf16>
      tpu.vector_store %arg6[%c1_40, %c0_41, %c4], %48 {strides = array<i32>} : memref<18x16x12xbf16, #tpu.memory_space<vmem>>, vector<16x16x4xbf16>,
      %c0_42 = arith.constant 0 : index
      %c0_43 = arith.constant 0 : index
      %c0_44 = arith.constant 0 : index
      %c0_45 = arith.constant 0 : index
      %50 = vector.load %arg2[%c0_42, %c0_43, %c0_44, %c0_45] : memref<1x16x16x4xbf16, #tpu.memory_space<vmem>>, vector<1x16x15x4xbf16>
      %51 = vector.shape_cast %50 : vector<1x16x15x4xbf16> to vector<16x15x4xbf16>
      %c1_46 = arith.constant 1 : index
      %c1_47 = arith.constant 1 : index
      %c0_48 = arith.constant 0 : index
      %52 = vector.load %arg6[%c1_46, %c1_47, %c0_48] : memref<18x16x12xbf16, #tpu.memory_space<vmem>>, vector<16x15x4xbf16>
      tpu.vector_store %arg6[%c1_46, %c1_47, %c0_48], %51 {strides = array<i32>} : memref<18x16x12xbf16, #tpu.memory_space<vmem>>, vector<16x15x4xbf16>,
      %c0_49 = arith.constant 0 : index
      %c0_50 = arith.constant 0 : index
      %c1_51 = arith.constant 1 : index
      %c0_52 = arith.constant 0 : index
      %53 = vector.load %arg2[%c0_49, %c0_50, %c1_51, %c0_52] : memref<1x16x16x4xbf16, #tpu.memory_space<vmem>>, vector<1x16x15x4xbf16>
      %54 = vector.shape_cast %53 : vector<1x16x15x4xbf16> to vector<16x15x4xbf16>
      %c1_53 = arith.constant 1 : index
      %c0_54 = arith.constant 0 : index
      %c8_55 = arith.constant 8 : index
      %55 = vector.load %arg6[%c1_53, %c0_54, %c8_55] : memref<18x16x12xbf16, #tpu.memory_space<vmem>>, vector<16x15x4xbf16>
      tpu.vector_store %arg6[%c1_53, %c0_54, %c8_55], %54 {strides = array<i32>} : memref<18x16x12xbf16, #tpu.memory_space<vmem>>, vector<16x15x4xbf16>,
    } else {
    }
    %c0 = arith.constant 0 : index
    %c0_1 = arith.constant 0 : index
    %3 = vector.load %arg4[%c0, %c0_1] : memref<1x128xf32, #tpu.memory_space<vmem>>, vector<1x128xf32>
    %c0_i32_2 = arith.constant 0 : i32
    %c16_i32 = arith.constant 16 : i32
    %4 = arith.muli %c0_i32_2, %c16_i32 : i32
    %5 = tpu.assume_multiple %4, 16 : i32
    %6 = arith.index_cast %5 : i32 to index
    %c0_3 = arith.constant 0 : index
    %c0_4 = arith.constant 0 : index
    %7 = vector.load %arg6[%6, %c0_3, %c0_4] : memref<18x16x12xbf16, #tpu.memory_space<vmem>>, vector<16x16x12xbf16>
    %c0_5 = arith.constant 0 : index
    %c0_6 = arith.constant 0 : index
    %c0_7 = arith.constant 0 : index
    %8 = vector.load %arg3[%c0_5, %c0_6, %c0_7] : memref<3x12x128xbf16, #tpu.memory_space<vmem>>, vector<1x12x128xbf16>
    %9 = vector.shape_cast %8 : vector<1x12x128xbf16> to vector<12x128xbf16>
    %cst = arith.constant dense<0.000000e+00> : vector<16x16x128xf32>
    %10 = tpu.matmul %7, %9, %cst {dimension_numbers = #tpu.dot_dimension_numbers<[2], [0], [0, 1], [1], [0, 0, 0, 1, 1, 1], [], []>} : vector<16x16x12xbf16>, vector<12x128xbf16>, vector<16x16x128xf32> -> vector<16x16x128xf32>
    %c1_i32 = arith.constant 1 : i32
    %11 = arith.addi %5, %c1_i32 : i32
    %12 = arith.index_cast %11 : i32 to index
    %c0_8 = arith.constant 0 : index
    %c0_9 = arith.constant 0 : index
    %13 = vector.load %arg6[%12, %c0_8, %c0_9] : memref<18x16x12xbf16, #tpu.memory_space<vmem>>, vector<16x16x12xbf16>
    %c1 = arith.constant 1 : index
    %c0_10 = arith.constant 0 : index
    %c0_11 = arith.constant 0 : index
    %14 = vector.load %arg3[%c1, %c0_10, %c0_11] : memref<3x12x128xbf16, #tpu.memory_space<vmem>>, vector<1x12x128xbf16>
    %15 = vector.shape_cast %14 : vector<1x12x128xbf16> to vector<12x128xbf16>
    %cst_12 = arith.constant dense<0.000000e+00> : vector<16x16x128xf32>
    %16 = tpu.matmul %13, %15, %cst_12 {dimension_numbers = #tpu.dot_dimension_numbers<[2], [0], [0, 1], [1], [0, 0, 0, 1, 1, 1], [], []>} : vector<16x16x12xbf16>, vector<12x128xbf16>, vector<16x16x128xf32> -> vector<16x16x128xf32>
    %17 = arith.addf %10, %16 : vector<16x16x128xf32>
    %c2_i32 = arith.constant 2 : i32
    %18 = arith.addi %5, %c2_i32 : i32
    %19 = arith.index_cast %18 : i32 to index
    %c0_13 = arith.constant 0 : index
    %c0_14 = arith.constant 0 : index
    %20 = vector.load %arg6[%19, %c0_13, %c0_14] : memref<18x16x12xbf16, #tpu.memory_space<vmem>>, vector<16x16x12xbf16>
    %c2 = arith.constant 2 : index
    %c0_15 = arith.constant 0 : index
    %c0_16 = arith.constant 0 : index
    %21 = vector.load %arg3[%c2, %c0_15, %c0_16] : memref<3x12x128xbf16, #tpu.memory_space<vmem>>, vector<1x12x128xbf16>
    %22 = vector.shape_cast %21 : vector<1x12x128xbf16> to vector<12x128xbf16>
    %cst_17 = arith.constant dense<0.000000e+00> : vector<16x16x128xf32>
    %23 = tpu.matmul %20, %22, %cst_17 {dimension_numbers = #tpu.dot_dimension_numbers<[2], [0], [0, 1], [1], [0, 0, 0, 1, 1, 1], [], []>} : vector<16x16x12xbf16>, vector<12x128xbf16>, vector<16x16x128xf32> -> vector<16x16x128xf32>
    %24 = arith.addf %17, %23 : vector<16x16x128xf32>
    %25 = vector.shape_cast %3 : vector<1x128xf32> to vector<1x1x128xf32>
    %26 = vector.broadcast %25 : vector<1x1x128xf32> to vector<16x16x128xf32>
    %27 = arith.addf %24, %26 : vector<16x16x128xf32>
    %28 = arith.negf %27 : vector<16x16x128xf32>
    %29 = math.exp %28 : vector<16x16x128xf32>
    %cst_18 = arith.constant 1.000000e+00 : f32
    %30 = vector.broadcast %cst_18 : f32 to vector<16x16x128xf32>
    %31 = arith.addf %30, %29 : vector<16x16x128xf32>
    %32 = arith.divf %30, %31 : vector<16x16x128xf32>
    %33 = arith.mulf %27, %32 : vector<16x16x128xf32>
    %34 = arith.truncf %33 : vector<16x16x128xf32> to vector<16x16x128xbf16>
    %c0_19 = arith.constant 0 : index
    %35 = arith.index_cast %5 : i32 to index
    %c0_20 = arith.constant 0 : index
    %c0_21 = arith.constant 0 : index
    %36 = vector.load %arg5[%c0_19, %35, %c0_20, %c0_21] : memref<1x16x16x128xbf16, #tpu.memory_space<vmem>>, vector<1x16x16x128xbf16>
    %37 = vector.shape_cast %36 : vector<1x16x16x128xbf16> to vector<16x16x128xbf16>
    %38 = vector.shape_cast %34 : vector<16x16x128xbf16> to vector<1x16x16x128xbf16>
    tpu.vector_store %arg5[%c0_19, %35, %c0_20, %c0_21], %38 {strides = array<i32>} : memref<1x16x16x128xbf16, #tpu.memory_space<vmem>>, vector<1x16x16x128xbf16>,
    %c1_i32_22 = arith.constant 1 : i32
    return
  }
  func.func @transform_0(%arg0: i32, %arg1: i32) -> (i32, i32, i32, i32) {
    %c0_i32 = arith.constant 0 : i32
    %c0_i32_0 = arith.constant 0 : i32
    %c0_i32_1 = arith.constant 0 : i32
    %c0_i32_2 = arith.constant 0 : i32
    return %arg0, %c0_i32, %c0_i32_0, %c0_i32_1 : i32, i32, i32, i32
  }
  func.func @transform_1(%arg0: i32, %arg1: i32) -> (i32, i32, i32) {
    %c0_i32 = arith.constant 0 : i32
    %c0_i32_0 = arith.constant 0 : i32
    %c0_i32_1 = arith.constant 0 : i32
    return %c0_i32, %c0_i32_0, %arg1 : i32, i32, i32
  }
  func.func @transform_2(%arg0: i32, %arg1: i32) -> (i32, i32) {
    %c0_i32 = arith.constant 0 : i32
    %c0_i32_0 = arith.constant 0 : i32
    return %c0_i32, %arg1 : i32, i32
  }
  func.func @transform_3(%arg0: i32, %arg1: i32) -> (i32, i32, i32, i32) {
    %c0_i32 = arith.constant 0 : i32
    %c0_i32_0 = arith.constant 0 : i32
    %c0_i32_1 = arith.constant 0 : i32
    return %arg0, %c0_i32, %c0_i32_0, %arg1 : i32, i32, i32, i32
  }
}

</mosaic_0001>

<bundles_post_ra>
// kernel: tpu_custom_call.1
= control target key start
LH: loop header
LB: loop body
LE: loop exit
PB: predicated region body
PF: predicated region fallthrough
CT: control target
= control target key end

     0   :  { %8 = vsyncpa [#allocation4], 0  ;;  %s4830_s0 = inlined_call_operand.vmem [shape: bf16[2,16,16,4], index: 0, kind: input, shape index: {}]   ;;  %s4831_s1 = inlined_call_operand.vmem [shape: bf16[3,12,128], index: 1, kind: input, shape index: {}]   ;;  %s4832_s2 = inlined_call_operand.vmem [shape: f32[1,128], index: 2, kind: input, shape index: {}]   ;;  %s4833_s3 = inlined_call_operand.hbm [shape: bf16[2,16,16,128], index: 3, kind: output, shape index: {}]  }
   0x1   :  { %10 = vsyncpa [#allocation4 + $0x1], 0  ;;  %s3806_s12 = smov 0   ;;  %s3808_s13 = smov 0  }
   0x2   :  { %s3810_s14 = smov 0   ;;  %s3812_s15 = smov 0  }
   0x3   :  { %s3814_s16 = smov 0   ;;  %s3816_s17 = smov 0  }
   0x4 LB: > { %s2994_s18 = sadd.s32 4294967295, %s3779_s17   ;;  %s2995_s19 = sadd.s32 4294967294, %s3779_s17   ;;  %s3779_s17 = sphi %s3816_s17, %s16_s17   ;;  %s3775_s16 = sphi %s3814_s16, %s4852_s16   ;;  %s3771_s15 = sphi %s3812_s15, %s4851_s15   ;;  %s3767_s14 = sphi %s3810_s14, %s4850_s14   ;;  %s3763_s13 = sphi %s3808_s13, %s4849_s13   ;;  %s3759_s12 = sphi %s3806_s12, %s4848_s12  }
   0x5   : > { %s28_s20 = sadd.s32 1, %s3775_s16  ;;  %s115_s21 = sadd.s32 1, %s3767_s14 }
   0x6   : > { %p30_p0 = scmp.ge.s32.totalorder %s28_s20, 2  ;;  %p125_p1 = scmp.ne.s32.totalorder %s3767_s14, %s3763_s13 }
   0x7   : > { %p126_p2 = scmp.eq.s32.totalorder %s2994_s18, 1  ;;  %p131_p3 = scmp.ne.s32.totalorder %s3763_s13, %s3759_s12 }
   0x8   : > { %s4854_s20 = smov (%p30_p0, %s28_s20), 0  ;;  %p132_p5 = scmp.eq.s32.totalorder %s2995_s19, 1 }
   0x9   : > { %p3846_p4 = por %p126_p2, %p125_p1  ;;  %s110_s23 = ssub.s32 %s3775_s16, %s4854_s20 }
   0xa   : > { %p3000_p6 = scmp.ge.s32.totalorder %s3779_s17, 1  ;;  %p113_p7 = scmp.eq.s32.totalorder %s110_s23, 0 }
   0xb   : > { %p3853_p8 = por %p132_p5, %p131_p3  ;;  %p171_p9 = scmp.lt.s32.totalorder %s3779_s17, 3 }
   0xc   : > { %s3859_s25 = scalar_select %p113_p7, %s3767_s14, %s115_s21  }
   0xd   : > { %p172_p10 = pnand %p3000_p6, %p171_p9 }
   0xe   : > { %p202_p11 = scmp.lt.s32.totalorder (!%p172_p10), %s3771_s15, 1  ;;  %s3781_s4 = smov (!%p172_p10), 4  }
   0xf   : > { %175 = sbr.rel (%p172_p10) target bundleno = 592 (0x250), region = 32  ;;  %s3782_s5 = smov (!%p172_p10), 8  }
  0x10   : > { %s199_s21 = sand.u32 (!%p172_p10), 1, %s3763_s13   ;;  %s3784_s7 = smov (!%p172_p10), [#allocation3]  }
  0x11   : > { %s4652_s23 = sshll.u32 (!%p172_p10), %s199_s21, 7  ;;  %s3707_s8 = sshll.u32 (!%p172_p10), %s3784_s7, 4  ;;  %s3708_s8 = int_to_ptr.vmem [resolvable:$false] %s3707_s8 }
  0x12   : > { %s3709_s9 = scalar_lea.vmem (!%p172_p10), %s3708_s8, 4096 }
  0x14   : > { %vm226_vm0 = vcmask 24576   ;;  %vm227_vm1 = vsmask.f32 256  ;;  %v256_v0 = vld [vmem:[#allocation2 + $0x50] sm:$0x1]  ;;  %s203_s26 = scalar_select %p202_p11, %s3771_s15, 1 }
  0x15   : > { %vm3864_vm2 = vmand %vm226_vm0, %vm227_vm1  ;;  %vm277_vm3 = vcmask 93251   ;;  %v253_v3 = vld [vmem:[#allocation2 + $0x48] sm:$0x1]  ;;  %vm278_vm4 = vsmask.f32 7950  ;;  %vm1624_vm9 = vcmask 1045504  }
  0x16   : > { %v257_v2 = vsel %vm3864_vm2, 0, %v256_v0  ;;  %s3177_s27 = sshll.u32 %s203_s26, 7  ;;  %v254_v4 = vsel %vm3864_vm2, 0, %v253_v3  ;;  %v307_v5 = vld [vmem:[#allocation2 + $0x54] sm:$0x8]  ;;  %vm3877_vm5 = vmand %vm277_vm3, %vm278_vm4  ;;  %vm488_vm11 = vcmask 60448  }
  0x17   : > { %258 = vst [vmem:[#allocation2 + $0x50] sm:$0x1] %v257_v2  ;;  %s3875_s30 = scalar_lea.vmem %s4830_s0, %s3177_s27  ;;  %255 = vst [vmem:[#allocation2 + $0x48] sm:$0x1] %v254_v4  ;;  %v304_v7 = vld [vmem:[#allocation2 + $0x4c] sm:$0x8] }
  0x18   : > { %v346_v8 = vld [vmem:[%s3875_s30 + $0x48] sm:$0xf]  ;;  %v344_v9 = vld [vmem:[%s3875_s30 + $0x40] sm:$0xf]  ;;  %v308_v10 = vsel %vm3877_vm5, 0, %v307_v5  ;;  %v305_v11 = vsel %vm3877_vm5, 0, %v304_v7 }
  0x19   : > { %428 = vrot.lane.b32.xlu1 %v346_v8, %s3781_s4  ;;  %424 = vrot.lane.b32.xlu0 %v344_v9, %s3781_s4  ;;  %v347_v12 = vld [vmem:[%s3875_s30 + $0x4c] sm:$0xf]  ;;  %v345_v13 = vld [vmem:[%s3875_s30 + $0x44] sm:$0xf]  ;;  %309 = vst [vmem:[#allocation2 + $0x54] sm:$0x8] %v308_v10 }
  0x1a   : > { %306 = vst [vmem:[#allocation2 + $0x4c] sm:$0x8] %v305_v11  ;;  %v329_v14 = vld [vmem:[%s3875_s30 + $0x4] sm:$0xf]  ;;  %v328_v15 = vld [vmem:[%s3875_s30] sm:$0xf] }
  0x1b   : > { %v928_v16 = vld [vmem:[%s3875_s30 + $0x44] sm:$0xf]  ;;  %v927_v17 = vld [vmem:[%s3875_s30 + $0x40] sm:$0xf]  ;;  %v331_v20 = vld [vmem:[%s3875_s30 + $0xc] sm:$0xf] }
  0x1c   : > { %v1108_v18 = vshll.u32 %v928_v16, 16  ;;  %v1112_v19 = vshrl.u32 %v928_v16, 16  ;;  %v330_v21 = vld [vmem:[%s3875_s30 + $0x8] sm:$0xf]  ;;  %v1099_v22 = vshrl.u32 %v927_v17, 16  ;;  %v1102_v23 = vshll.u32 %v927_v17, 16 }
  0x1d   : > { %430 = vrot.lane.b32.xlu1 %v347_v12, %s3781_s4  ;;  %426 = vrot.lane.b32.xlu0 %v345_v13, %s3781_s4  ;;  %v930_v26 = vld [vmem:[%s3875_s30 + $0x4c] sm:$0xf]  ;;  %v349_v28 = vld [vmem:[%s3875_s30 + $0x54] sm:$0xf]  ;;  %vm943_vm6 = vsmask.f32 3328 }
  0x1e   : > { %v1110_v24 = vrot.slane %v1108_v18, 5  ;;  %v1114_v25 = vrot.slane %v1112_v19, 4  ;;  %v280_v27 = vld [vmem:[#allocation2 + $0xc] sm:$0x8]  ;;  %v348_v29 = vld [vmem:[%s3875_s30 + $0x50] sm:$0xf] }
  0x1f   : > { %v1101_v30 = vrot.slane %v1099_v22, 4  ;;  %v1104_v31 = vrot.slane %v1102_v23, 5  ;;  %v1127_v32 = vshll.u32 %v930_v26, 16  ;;  %v1131_v33 = vshrl.u32 %v930_v26, 16  ;;  %v351_v35 = vld [vmem:[%s3875_s30 + $0x5c] sm:$0xf] }
  0x20   : > { %v281_v34 = vsel %vm3877_vm5, 0, %v280_v27  ;;  %v1115_v36 = vor.u32 %v1114_v25, %v1110_v24  ;;  %v912_v37 = vld [vmem:[%s3875_s30 + $0x4] sm:$0xf]  ;;  %v350_v38 = vld [vmem:[%s3875_s30 + $0x58] sm:$0xf]  ;;  %vm843_vm12 = vcmask 27648  }
  0x21   : > { %394 = vrot.lane.b32.xlu1 %v329_v14, %s3781_s4  ;;  %392 = vrot.lane.b32.xlu0 %v328_v15, %s3781_s4  ;;  %282 = vst [vmem:[#allocation2 + $0xc] sm:$0x8] %v281_v34  ;;  %v1105_v39 = vor.u32 %v1104_v31, %v1101_v30  ;;  %v911_v40 = vld [vmem:[%s3875_s30] sm:$0xf]  ;;  %v929_v41 = vld [vmem:[%s3875_s30 + $0x48] sm:$0xf] }
  0x22   : > { %vm944_vm7 = vsmask.f32 7440  ;;  %v1129_v42 = vrot.slane %v1127_v32, 5  ;;  %v1133_v43 = vrot.slane %v1131_v33, 4  ;;  %v956_v44 = vshll.u32 %v912_v37, 16  ;;  %s4672_s26 = scalar_lea.vmem [#allocation3], %s4652_s23 }
  0x23   : > { %v960_v45 = vshrl.u32 %v912_v37, 16  ;;  %v1116_v46 = vrot.slane %v1115_v36, 4  ;;  %v947_v47 = vshrl.u32 %v911_v40, 16  ;;  %v950_v48 = vshll.u32 %v911_v40, 16  ;;  %v332_v50 = vld [vmem:[%s3875_s30 + $0x10] sm:$0xf]  ;;  %vm3919_vm8 = vmor %vm943_vm6, %vm944_vm7 }
  0x24   : > { %v1118_v49 = vshrl.u32 %v929_v41, 16  ;;  %v1106_v51 = vrot.slane %v1105_v39, 4  ;;  %v1121_v52 = vshll.u32 %v929_v41, 16  ;;  %v913_v54 = vld [vmem:[%s3875_s30 + $0x8] sm:$0xf]  ;;  %v958_v55 = vrot.slane %v956_v44, 5 }
  0x25   : > { %398 = vrot.lane.b32.xlu1 %v331_v20, %s3781_s4  ;;  %396 = vrot.lane.b32.xlu0 %v330_v21, %s3781_s4  ;;  %v962_v56 = vrot.slane %v960_v45, 4  ;;  %v333_v57 = vld [vmem:[%s3875_s30 + $0x14] sm:$0xf]  ;;  %v1134_v58 = vor.u32 %v1133_v43, %v1129_v42  ;;  %v949_v59 = vrot.slane %v947_v47, 4  ;;  %v952_v60 = vrot.slane %v950_v48, 5  ;;  %s3210_s27 = sshll.u32 %s3771_s15, 11 }
  0x26   : > { %v1120_v61 = vrot.slane %v1118_v49, 4  ;;  %v1111_v62 = vsel %vm3919_vm8, %v1106_v51, %v1110_v24  ;;  %v1123_v63 = vrot.slane %v1121_v52, 5  ;;  %v914_v0 = vld [vmem:[%s3875_s30 + $0xc] sm:$0xf]  ;;  %v966_v2 = vshrl.u32 %v913_v54, 16  ;;  %s2893_s28 = sshll.u32 %s4672_s26, 4  ;;  %s4779_s28 = int_to_ptr.vmem [resolvable:$true] %s2893_s28 }
  0x27   : > { %v969_v3 = vshll.u32 %v913_v54, 16  ;;  %v1135_v4 = vrot.slane %v1134_v58, 4  ;;  %v963_v5 = vor.u32 %v962_v56, %v958_v55  ;;  %v975_v7 = vshll.u32 %v914_v0, 16  ;;  %v334_v9 = vld [vmem:[%s3875_s30 + $0x18] sm:$0xf]  ;;  %s4784_s15 = scalar_lea.sflag [#allocation4], %s199_s21  ;;  %p3710_p1 = scmp.lt.s32.totalorder %s4779_s28, %s3708_s8 }
  0x28   : > { %v979_v8 = vshrl.u32 %v914_v0, 16  ;;  %v953_v10 = vor.u32 %v952_v60, %v949_v59  ;;  %v1124_v11 = vor.u32 %v1123_v63, %v1120_v61  ;;  %v968_v12 = vrot.slane %v966_v2, 4  ;;  %v335_v17 = vld [vmem:[%s3875_s30 + $0x1c] sm:$0xf]  ;;  %v932_v25 = vld [vmem:[%s3875_s30 + $0x54] sm:$0xf] }
  0x29   : > { %434 = vrot.lane.b32.xlu1 %v349_v28, %s3781_s4  ;;  %432 = vrot.lane.b32.xlu0 %v348_v29, %s3781_s4  ;;  %v971_v13 = vrot.slane %v969_v3, 5  ;;  %v964_v14 = vrot.slane %v963_v5, 4  ;;  %v977_v15 = vrot.slane %v975_v7, 5  ;;  %v931_v26 = vld [vmem:[%s3875_s30 + $0x50] sm:$0xf]  ;;  %v1146_v28 = vshll.u32 %v932_v25, 16 }
  0x2a   : > { %v981_v16 = vrot.slane %v979_v8, 4  ;;  %v954_v18 = vrot.slane %v953_v10, 4  ;;  %v1125_v19 = vrot.slane %v1124_v11, 4  ;;  %v1150_v29 = vshrl.u32 %v932_v25, 16  ;;  %v353_v36 = vld [vmem:[%s3875_s30 + $0x64] sm:$0xf] }
  0x2b   : > { %v972_v20 = vor.u32 %v971_v13, %v968_v12  ;;  %v1137_v31 = vshrl.u32 %v931_v26, 16  ;;  %v1140_v32 = vshll.u32 %v931_v26, 16  ;;  %v1148_v33 = vrot.slane %v1146_v28, 5  ;;  %v352_v37 = vld [vmem:[%s3875_s30 + $0x60] sm:$0xf]  ;;  %s3703_s6 = scalar_lea.vmem %s4779_s28, 2048 }
  0x2c   : > { %v982_v21 = vor.u32 %v981_v16, %v977_v15  ;;  %v959_v22 = vsel %vm3919_vm8, %v954_v18, %v958_v55  ;;  %v1130_v23 = vsel %vm3919_vm8, %v1125_v19, %v1129_v42  ;;  %v1152_v34 = vrot.slane %v1150_v29, 4  ;;  %v916_v43 = vld [vmem:[%s3875_s30 + $0x14] sm:$0xf]  ;;  %v355_v44 = vld [vmem:[%s3875_s30 + $0x6c] sm:$0xf]  ;;  %p3704_p12 = scmp.ne.s32.totalorder %s4779_s28, %s3703_s6  ;;  %p3711_p2 = scmp.lt.s32.totalorder %s3709_s9, %s3703_s6 }
  0x2d   : > { %438 = vrot.lane.b32.xlu1 %v351_v35, %s3781_s4  ;;  %436 = vrot.lane.b32.xlu0 %v350_v38, %s3781_s4  ;;  %v973_v24 = vrot.slane %v972_v20, 4  ;;  %v934_v35 = vld [vmem:[%s3875_s30 + $0x5c] sm:$0xf]  ;;  %v1139_v38 = vrot.slane %v1137_v31, 4  ;;  %v1142_v39 = vrot.slane %v1140_v32, 5  ;;  %v998_v51 = vshrl.u32 %v916_v43, 16 }
  0x2e   : > { %v983_v27 = vrot.slane %v982_v21, 4  ;;  %v1165_v40 = vshll.u32 %v934_v35, 16  ;;  %v1153_v41 = vor.u32 %v1152_v34, %v1148_v33  ;;  %v1169_v42 = vshrl.u32 %v934_v35, 16  ;;  %v354_v45 = vld [vmem:[%s3875_s30 + $0x68] sm:$0xf]  ;;  %p3705_p13 = pnand %p3704_p12, %p3846_p4  ;;  %p3712_p3 = por %p3711_p2, %p3710_p1 }
  0x2f   : > { %v978_v30 = vsel %vm3919_vm8, %v973_v24, %v977_v15  ;;  %v915_v47 = vld [vmem:[%s3875_s30 + $0x10] sm:$0xf]  ;;  %v933_v48 = vld [vmem:[%s3875_s30 + $0x58] sm:$0xf]  ;;  %v336_v52 = vld [vmem:[%s3875_s30 + $0x20] sm:$0xf] }
  0x30   : > { %v3960_v49 = vrot.slane %v1165_v40, 5  ;;  %v1154_v54 = vrot.slane %v1153_v41, 4  ;;  %v1171_v55 = vrot.slane %v1169_v42, 4  ;;  %v985_v56 = vshrl.u32 %v915_v47, 16  ;;  %v917_v61 = vld [vmem:[%s3875_s30 + $0x18] sm:$0xf]  ;;  %p3706_p0 = pneg %p3705_p13 }
  0x31   : > { %400 = vrot.lane.b32.xlu1 %v332_v50, %s3781_s4  ;;  %1284 = vrot.lane.b32.xlu0 %v1116_v46, %s3782_s5  ;;  %v1143_v46 = vor.u32 %v1142_v39, %v1139_v38  ;;  %v994_v50 = vshll.u32 %v916_v43, 16  ;;  %v1156_v59 = vshrl.u32 %v933_v48, 16  ;;  %v1159_v60 = vshll.u32 %v933_v48, 16  ;;  %v229_v7 = vld [vmem:[#allocation2 + $0x8] sm:$0x1] }
  0x32   : > { %v1000_v0 = vrot.slane %v998_v51, 4  ;;  %v1172_v2 = vor.u32 %v1171_v55, %v3960_v49  ;;  %v987_v3 = vrot.slane %v985_v56, 4  ;;  %v1004_v5 = vshrl.u32 %v917_v61, 16  ;;  %v918_v11 = vld [vmem:[%s3875_s30 + $0x1c] sm:$0xf]  ;;  %p3713_p5 = pnand %p3712_p3, %p3706_p0 }
  0x33   : > { %v1144_v58 = vrot.slane %v1143_v46, 4  ;;  %v3967_v63 = vrot.slane %v994_v50, 5  ;;  %v1161_v10 = vrot.slane %v1159_v60, 5  ;;  %v1007_v12 = vshll.u32 %v917_v61, 16  ;;  %v338_v18 = vld [vmem:[%s3875_s30 + $0x28] sm:$0xf] }
  0x34   : > { %v230_v13 = vsel %vm3864_vm2, 0, %v229_v7  ;;  %v1013_v16 = vshll.u32 %v918_v11, 16  ;;  %v1006_v21 = vrot.slane %v1004_v5, 4  ;;  %v232_v24 = vld [vmem:[#allocation2 + $0x10] sm:$0x1]  ;;  %vm219_vm15 = vcmask 93184  }
  0x35   : > { %1282 = vrot.lane.b32.xlu1 %v1111_v62, %s3782_s5  ;;  %402 = vrot.lane.b32.xlu0 %v333_v57, %s3781_s4  ;;  %v988_v57 = vshll.u32 %v915_v47, 16  ;;  %v337_v62 = vld [vmem:[%s3875_s30 + $0x24] sm:$0xf]  ;;  %v1149_v8 = vsel %vm3919_vm8, %v1144_v58, %v1148_v33  ;;  %v1001_v15 = vor.u32 %v1000_v0, %v3967_v63  ;;  %231 = vst [vmem:[#allocation2 + $0x8] sm:$0x1] %v230_v13  ;;  %vm1575_vm3 = vcmask 97280  }
  0x36   : > { %v310_v25 = vld [vmem:[#allocation2 + $0x5c] sm:$0x8]  ;;  %v1015_v28 = vrot.slane %v1013_v16, 5  ;;  %v259_v34 = vld [vmem:[#allocation2 + $0x58] sm:$0x1] }
  0x37   : > { %v1002_v26 = vrot.slane %v1001_v15, 4  ;;  %v936_v35 = vld [vmem:[%s3875_s30 + $0x64] sm:$0xf]  ;;  %v935_v40 = vld [vmem:[%s3875_s30 + $0x60] sm:$0xf]  ;;  %v260_v41 = vsel %vm3864_vm2, 0, %v259_v34 }
  0x38   : > { %v313_v38 = vld [vmem:[#allocation2 + $0x64] sm:$0x8]  ;;  %261 = vst [vmem:[#allocation2 + $0x58] sm:$0x1] %v260_v41  ;;  %v1188_v46 = vshrl.u32 %v936_v35, 16  ;;  %v1175_v50 = vshrl.u32 %v935_v40, 16 }
  0x39   : > { %404 = vrot.lane.b32.xlu1 %v334_v9, %s3781_s4  ;;  %1288 = vrot.lane.b32.xlu0 %v1135_v4, %s3782_s5  ;;  %v990_v4 = vrot.slane %v988_v57, 5  ;;  %v1158_v9 = vrot.slane %v1156_v59, 4  ;;  %v314_v47 = vsel %vm3877_vm5, 0, %v313_v38  ;;  %v262_v48 = vld [vmem:[#allocation2 + $0x60] sm:$0x1]  ;;  %v1178_v51 = vshll.u32 %v935_v40, 16 }
  0x3a   : > { %315 = vst [vmem:[#allocation2 + $0x64] sm:$0x8] %v314_v47  ;;  %v286_v55 = vld [vmem:[#allocation2 + $0x1c] sm:$0x8]  ;;  %v263_v58 = vsel %vm3864_vm2, 0, %v262_v48 }
  0x3b   : > { %v991_v19 = vor.u32 %v990_v4, %v987_v3  ;;  %v1162_v20 = vor.u32 %v1161_v10, %v1158_v9  ;;  %v238_v59 = vld [vmem:[#allocation2 + $0x20] sm:$0x1]  ;;  %v920_v61 = vld [vmem:[%s3875_s30 + $0x24] sm:$0xf]  ;;  %264 = vst [vmem:[#allocation2 + $0x60] sm:$0x1] %v263_v58 }
  0x3c   : > { %v357_v0 = vld [vmem:[%s3875_s30 + $0x74] sm:$0xf]  ;;  %v1177_v3 = vrot.slane %v1175_v50, 4  ;;  %v1180_v4 = vrot.slane %v1178_v51, 5  ;;  %v287_v5 = vsel %vm3877_vm5, 0, %v286_v55  ;;  %v1036_v16 = vshrl.u32 %v920_v61, 16 }
  0x3d   : > { %1252 = vrot.lane.b32.xlu1 %v964_v14, %s3782_s5  ;;  %406 = vrot.lane.b32.xlu0 %v335_v17, %s3781_s4  ;;  %v1173_v14 = vrot.slane %v1172_v2, 4  ;;  %v1017_v17 = vshrl.u32 %v918_v11, 16  ;;  %v992_v31 = vrot.slane %v991_v19, 4  ;;  %v1163_v32 = vrot.slane %v1162_v20, 4  ;;  %288 = vst [vmem:[#allocation2 + $0x1c] sm:$0x8] %v287_v5 }
  0x3e   : > { %v1190_v2 = vrot.slane %v1188_v46, 4  ;;  %v3525_v9 = vld [vmem:[%s4831_s1 + $0x8] sm:$0x3f]   ;;  %v316_v10 = vld [vmem:[#allocation2 + $0x6c] sm:$0x8] }
  0x3f   : > { %v1019_v29 = vrot.slane %v1017_v17, 4  ;;  %v997_v42 = vsel %vm3919_vm8, %v992_v31, %v3967_v63  ;;  %v1168_v43 = vsel %vm3919_vm8, %v1163_v32, %v3960_v49  ;;  %v289_v63 = vld [vmem:[#allocation2 + $0x24] sm:$0x8]  ;;  %v356_v11 = vld [vmem:[%s3875_s30 + $0x70] sm:$0xf]  ;;  %3462 = vmatprep.subr.msk.bf16.mxu1 %vm1624_vm9, %v3525_v9  ;;  %3461 = vmatprep.subr.msk.bf16.mxu0 %vm1624_vm9, %v3525_v9 }
  0x40   : > { %v919_v13 = vld [vmem:[%s3875_s30 + $0x20] sm:$0xf]  ;;  %v937_v17 = vld [vmem:[%s3875_s30 + $0x68] sm:$0xf]  ;;  %v340_v38 = vld [vmem:[%s3875_s30 + $0x30] sm:$0xf] }
  0x41   : > { %1250 = vrot.lane.b32.xlu1 %v959_v22, %s3782_s5  ;;  %1286 = vrot.lane.b32.xlu0 %v1130_v23, %s3782_s5  ;;  %v1009_v22 = vrot.slane %v1007_v12, 5  ;;  %v283_v23 = vld [vmem:[#allocation2 + $0x14] sm:$0x8]  ;;  %v1020_v39 = vor.u32 %v1019_v29, %v1015_v28  ;;  %v1032_v12 = vshll.u32 %v920_v61, 16  ;;  %v921_v20 = vld [vmem:[%s3875_s30 + $0x28] sm:$0xf] }
  0x42   : > { %v1194_v31 = vshrl.u32 %v937_v17, 16  ;;  %v1197_v32 = vshll.u32 %v937_v17, 16  ;;  %v1042_v34 = vshrl.u32 %v921_v20, 16  ;;  %v241_v41 = vld [vmem:[#allocation2 + $0x28] sm:$0x1] }
  0x43   : > { %v1010_v33 = vor.u32 %v1009_v22, %v1006_v21  ;;  %v1021_v49 = vrot.slane %v1020_v39, 4  ;;  %v317_v21 = vsel %vm3877_vm5, 0, %v316_v10  ;;  %v265_v22 = vld [vmem:[#allocation2 + $0x68] sm:$0x1]  ;;  %v4042_v29 = vrot.slane %v1032_v12, 5 }
  0x44   : > { %318 = vst [vmem:[#allocation2 + $0x6c] sm:$0x8] %v317_v21  ;;  %v292_v46 = vld [vmem:[#allocation2 + $0x2c] sm:$0x8]  ;;  %v1196_v48 = vrot.slane %v1194_v31, 4  ;;  %v1199_v50 = vrot.slane %v1197_v32, 5 }
  0x45   : > { %1254 = vrot.lane.b32.xlu1 %v978_v30, %s3782_s5  ;;  %1256 = vrot.lane.b32.xlu0 %v983_v27, %s3782_s5  ;;  %v339_v27 = vld [vmem:[%s3875_s30 + $0x2c] sm:$0xf]  ;;  %v284_v30 = vsel %vm3877_vm5, 0, %v283_v23  ;;  %v1181_v23 = vor.u32 %v1180_v4, %v1177_v3  ;;  %v939_v51 = vld [vmem:[%s3875_s30 + $0x70] sm:$0xf]  ;;  %v293_v61 = vsel %vm3877_vm5, 0, %v292_v46 }
  0x46   : > { %285 = vst [vmem:[#allocation2 + $0x14] sm:$0x8] %v284_v30  ;;  %v1026_v30 = vshll.u32 %v919_v13, 16  ;;  %v244_v58 = vld [vmem:[#allocation2 + $0x30] sm:$0x1] }
  0x47   : > { %294 = vst [vmem:[#allocation2 + $0x2c] sm:$0x8] %v293_v61  ;;  %v341_v4 = vld [vmem:[%s3875_s30 + $0x34] sm:$0xf]  ;;  %v942_v31 = vld [vmem:[%s3875_s30 + $0x7c] sm:$0xf] }
  0x48   : > { %v1028_v47 = vrot.slane %v1026_v30, 5  ;;  %v301_v61 = vld [vmem:[#allocation2 + $0x44] sm:$0x8]  ;;  %vm553_vm10 = vsmask.f32 4368 }
  0x49   : > { %442 = vrot.lane.b32.xlu1 %v353_v36, %s3781_s4  ;;  %440 = vrot.lane.b32.xlu0 %v352_v37, %s3781_s4  ;;  %v233_v36 = vsel %vm3864_vm2, 0, %v232_v24  ;;  %v311_v37 = vsel %vm3877_vm5, 0, %v310_v25  ;;  %v1023_v25 = vshrl.u32 %v919_v13, 16  ;;  %v342_v13 = vld [vmem:[%s3875_s30 + $0x38] sm:$0xf]  ;;  %vm4203_vm14 = vmor %vm227_vm1, %vm553_vm10  ;;  %vm1346_vm1 = vcmask 93248  }
  0x4a   : > { %234 = vst [vmem:[#allocation2 + $0x10] sm:$0x1] %v233_v36  ;;  %312 = vst [vmem:[#allocation2 + $0x5c] sm:$0x8] %v311_v37  ;;  %v266_v36 = vsel %vm3864_vm2, 0, %v265_v22 }
  0x4b   : > { %v268_v37 = vld [vmem:[#allocation2 + $0x70] sm:$0x1]  ;;  %267 = vst [vmem:[#allocation2 + $0x68] sm:$0x1] %v266_v36  ;;  %v4165_v1 = vld [vmem:[%s3875_s30] sm:$0xf] }
  0x4c   : > { %vm844_vm13 = vsmask.f32 7938 }
  0x4d   : > { %446 = vrot.lane.b32.xlu1 %v355_v44, %s3781_s4  ;;  %444 = vrot.lane.b32.xlu0 %v354_v45, %s3781_s4  ;;  %v1011_v44 = vrot.slane %v1010_v33, 4  ;;  %v1184_v45 = vshll.u32 %v936_v35, 16  ;;  %v1038_v33 = vrot.slane %v1036_v16, 4  ;;  %v1045_v35 = vshll.u32 %v921_v20, 16  ;;  %vm4248_vm0 = vmand %vm843_vm12, %vm844_vm13 }
  0x4f   : > { %v1016_v56 = vsel %vm3919_vm8, %v1011_v44, %v1015_v28  ;;  %v4009_v57 = vrot.slane %v1184_v45, 5  ;;  %v358_v28 = vld [vmem:[%s3875_s30 + $0x78] sm:$0xf]  ;;  %v1025_v44 = vrot.slane %v1023_v25, 4  ;;  %v922_v45 = vld [vmem:[%s3875_s30 + $0x2c] sm:$0xf] }
  0x50   : > { %v1047_v55 = vrot.slane %v1045_v35, 5  ;;  %v325_v25 = vld [vmem:[#allocation2 + $0x84] sm:$0x8] }
  0x51   : > { %408 = vrot.lane.b32.xlu1 %v336_v52, %s3781_s4  ;;  %1292 = vrot.lane.b32.xlu0 %v1154_v54, %s3782_s5  ;;  %v938_v52 = vld [vmem:[%s3875_s30 + $0x6c] sm:$0xf]  ;;  %v235_v54 = vld [vmem:[#allocation2 + $0x18] sm:$0x1]  ;;  %v1191_v19 = vor.u32 %v1190_v2, %v4009_v57  ;;  %v295_v2 = vld [vmem:[#allocation2 + $0x34] sm:$0x8]  ;;  %v1029_v5 = vor.u32 %v1028_v47, %v1025_v44 }
  0x52   : > { %v1203_v60 = vshll.u32 %v938_v52, 16  ;;  %v1207_v7 = vshrl.u32 %v938_v52, 16  ;;  %v269_v52 = vsel %vm3864_vm2, 0, %v268_v37  ;;  %v923_v37 = vld [vmem:[%s3875_s30 + $0x30] sm:$0xf] }
  0x53   : > { %v1192_v39 = vrot.slane %v1191_v19, 4  ;;  %270 = vst [vmem:[#allocation2 + $0x70] sm:$0x1] %v269_v52  ;;  %v271_v19 = vld [vmem:[#allocation2 + $0x78] sm:$0x1] }
  0x54   : > { %v4030_v15 = vrot.slane %v1203_v60, 5  ;;  %v1209_v24 = vrot.slane %v1207_v7, 4  ;;  %v1055_v60 = vshrl.u32 %v922_v45, 16  ;;  %v1200_v7 = vor.u32 %v1199_v50, %v1196_v48  ;;  %v298_v44 = vld [vmem:[#allocation2 + $0x3c] sm:$0x8] }
  0x55   : > { %1290 = vrot.lane.b32.xlu1 %v1149_v8, %s3782_s5  ;;  %410 = vrot.lane.b32.xlu0 %v337_v62, %s3781_s4  ;;  %v236_v62 = vsel %vm3864_vm2, 0, %v235_v54  ;;  %v239_v8 = vsel %vm3864_vm2, 0, %v238_v59  ;;  %v1039_v54 = vor.u32 %v1038_v33, %v4042_v29  ;;  %v1051_v59 = vshll.u32 %v922_v45, 16  ;;  %v274_v33 = vld [vmem:[#allocation2 + $0x80] sm:$0x1] }
  0x56   : > { %237 = vst [vmem:[#allocation2 + $0x18] sm:$0x1] %v236_v62  ;;  %240 = vst [vmem:[#allocation2 + $0x20] sm:$0x1] %v239_v8  ;;  %v940_v62 = vld [vmem:[%s3875_s30 + $0x74] sm:$0xf] }
  0x57   : > { %v245_v8 = vsel %vm3864_vm2, 0, %v244_v58  ;;  %v1057_v16 = vrot.slane %v1055_v60, 4  ;;  %v1222_v17 = vshll.u32 %v940_v62, 16  ;;  %v1226_v22 = vshrl.u32 %v940_v62, 16  ;;  %v3534_v45 = vld [vmem:[%s4831_s1] sm:$0x3f]  }
  0x58   : > { %246 = vst [vmem:[#allocation2 + $0x30] sm:$0x1] %v245_v8  ;;  %v272_v32 = vsel %vm3864_vm2, 0, %v271_v19  ;;  %v275_v50 = vsel %vm3864_vm2, 0, %v274_v33  ;;  %v1241_v58 = vshll.u32 %v942_v31, 16  ;;  %v299_v60 = vsel %vm3877_vm5, 0, %v298_v44 }
  0x59   : > { %412 = vrot.lane.b32.xlu1 %v338_v18, %s3781_s4  ;;  %1296 = vrot.lane.b32.xlu0 %v1173_v14, %s3782_s5  ;;  %v290_v14 = vsel %vm3877_vm5, 0, %v289_v63  ;;  %v359_v18 = vld [vmem:[%s3875_s30 + $0x7c] sm:$0xf]  ;;  %v1213_v63 = vshrl.u32 %v939_v51, 16  ;;  %v4101_v36 = vrot.slane %v1222_v17, 5  ;;  %v4173_v6 = vsel %vm1624_vm9, %v3534_v45, 0 }
  0x5a   : > { %291 = vst [vmem:[#allocation2 + $0x24] sm:$0x8] %v290_v14  ;;  %v4075_v14 = vrot.slane %v1051_v59, 5  ;;  %273 = vst [vmem:[#allocation2 + $0x78] sm:$0x1] %v272_v32  ;;  %v1245_v59 = vshrl.u32 %v942_v31, 16 }
  0x5b   : > { %v1215_v20 = vrot.slane %v1213_v63, 4  ;;  %276 = vst [vmem:[#allocation2 + $0x80] sm:$0x1] %v275_v50  ;;  %300 = vst [vmem:[#allocation2 + $0x3c] sm:$0x8] %v299_v60 }
  0x5c   : > { %v1058_v35 = vor.u32 %v1057_v16, %v4075_v14  ;;  %v1247_v16 = vrot.slane %v1245_v59, 4 }
  0x5d   : > { %1260 = vrot.lane.b32.xlu1 %v1002_v26, %s3782_s5  ;;  %414 = vrot.lane.b32.xlu0 %v339_v27, %s3781_s4  ;;  %v1626_v26 = vsel %vm1624_vm9, %v3525_v9, 0  ;;  %v319_v27 = vld [vmem:[#allocation2 + $0x74] sm:$0x8]  ;;  %v322_v9 = vld [vmem:[#allocation2 + $0x7c] sm:$0x8] }
  0x5e   : > { %3460 = vmatpush3.bf16.msra.mxu1 %v1626_v26  ;;  %3358 = vmatpush3.bf16.msra.mxu0 %v1626_v26  ;;  %v320_v40 = vsel %vm3877_vm5, 0, %v319_v27  ;;  %v4089_v26 = vrot.slane %v1029_v5, 4  ;;  %v4091_v27 = vrot.slane %v1200_v7, 4 }
  0x5f   : > { %321 = vst [vmem:[#allocation2 + $0x74] sm:$0x8] %v320_v40  ;;  %3463 = vmatprep.subr.msk.bf16.mxu1 %vm1624_vm9, %v3534_v45 }
  0x60   : > { %v1035_v46 = vsel %vm3919_vm8, %v4089_v26, %v4042_v29  ;;  %v1206_v47 = vsel %vm3919_vm8, %v4091_v27, %v4030_v15  ;;  %v926_v26 = vld [vmem:[%s3875_s30 + $0x3c] sm:$0xf] }
  0x61   : > { %1258 = vrot.lane.b32.xlu1 %v997_v42, %s3782_s5  ;;  %1294 = vrot.lane.b32.xlu0 %v1168_v43, %s3782_s5  ;;  %v1182_v42 = vrot.slane %v1181_v23, 4  ;;  %v1210_v43 = vor.u32 %v1209_v24, %v4030_v15  ;;  %v4085_v23 = vld [vmem:[%s3875_s30 + $0x40] sm:$0xf]  ;;  %v323_v24 = vsel %vm3877_vm5, 0, %v322_v9 }
  0x62   : > { %324 = vst [vmem:[#allocation2 + $0x7c] sm:$0x8] %v323_v24  ;;  %v684_v48 = vshrl.u32 %v4085_v23, 16 }
  0x63   : > { %v1187_v3 = vsel %vm3919_vm8, %v1182_v42, %v4009_v57  ;;  %v1211_v10 = vrot.slane %v1210_v43, 4  ;;  %v4078_v57 = vld [vmem:[%s3875_s30 + $0x48] sm:$0xf]  ;;  %v941_v43 = vld [vmem:[%s3875_s30 + $0x78] sm:$0xf] }
  0x64   : > { %v700_v42 = vshrl.u32 %v4078_v57, 16  ;;  %v1232_v5 = vshrl.u32 %v941_v43, 16  ;;  %v1235_v7 = vshll.u32 %v941_v43, 16  ;;  %v4154_v9 = vrot.slane %v684_v48, 7 }
  0x65   : > { %1262 = vrot.lane.b32.xlu1 %v1016_v56, %s3782_s5  ;;  %1264 = vrot.lane.b32.xlu0 %v1021_v49, %s3782_s5  ;;  %v1044_v49 = vrot.slane %v1042_v34, 4  ;;  %v242_v56 = vsel %vm3864_vm2, 0, %v241_v41  ;;  %v343_v34 = vld [vmem:[%s3875_s30 + $0x3c] sm:$0xf]  ;;  %v4108_v41 = vrot.slane %v1226_v22, 4 }
  0x66   : > { %243 = vst [vmem:[#allocation2 + $0x28] sm:$0x1] %v242_v56  ;;  %v1059_v56 = vrot.slane %v1058_v35, 4  ;;  %v4147_v63 = vrot.slane %v700_v42, 7  ;;  %v1234_v24 = vrot.slane %v1232_v5, 4  ;;  %v690_v50 = vrot.slane %v4154_v9, 4 }
  0x67   : > { %v1048_v12 = vor.u32 %v1047_v55, %v1044_v49  ;;  %v4134_v49 = vld [vmem:[%s3875_s30 + $0x4c] sm:$0xf]  ;;  %v250_v55 = vld [vmem:[#allocation2 + $0x40] sm:$0x1] }
  0x68   : > { %v251_v8 = vsel %vm3864_vm2, 0, %v250_v55  ;;  %v708_v17 = vshrl.u32 %v4134_v49, 16  ;;  %v711_v33 = vshll.u32 %v4134_v49, 16  ;;  %v706_v48 = vrot.slane %v4147_v63, 4  ;;  %v4197_v49 = vld [vmem:[%s3875_s30 + $0x8] sm:$0xf] }
  0x69   : > { %450 = vrot.lane.b32.xlu1 %v357_v0, %s3781_s4  ;;  %448 = vrot.lane.b32.xlu0 %v356_v11, %s3781_s4  ;;  %v1216_v0 = vshll.u32 %v939_v51, 16  ;;  %v4072_v11 = vrot.slane %v1039_v54, 4  ;;  %v4094_v30 = vrot.slane %v1048_v12, 4  ;;  %v3535_v51 = vld [vmem:[%s4831_s1 + $0x10] sm:$0x3f]   ;;  %v572_v5 = vshrl.u32 %v4197_v49, 16 }
  0x6a   : > { %3464 = vmatprep.subr.msk.bf16.mxu0 %vm1624_vm9, %v3535_v51  ;;  %v925_v12 = vld [vmem:[%s3875_s30 + $0x38] sm:$0xf]  ;;  %252 = vst [vmem:[#allocation2 + $0x40] sm:$0x1] %v251_v8  ;;  %v4176_v22 = vsel %vm1624_vm9, %v3535_v51, 0  ;;  %v710_v35 = vrot.slane %v708_v17, 7 }
  0x6b   : > { %v1218_v21 = vrot.slane %v1216_v0, 5  ;;  %v1054_v52 = vsel %vm3919_vm8, %v4094_v30, %v4075_v14  ;;  %v538_v0 = vld [vmem:[%s3875_s30 + $0x44] sm:$0xf]  ;;  %v4161_v14 = vrot.slane %v1241_v58, 5  ;;  %v1080_v27 = vshrl.u32 %v925_v12, 16 }
  0x6c   : > { %v687_v8 = vshll.u32 %v4085_v23, 16 }
  0x6d   : > { %454 = vrot.lane.b32.xlu1 %v359_v18, %s3781_s4  ;;  %452 = vrot.lane.b32.xlu0 %v358_v28, %s3781_s4  ;;  %v296_v18 = vsel %vm3877_vm5, 0, %v295_v2  ;;  %v924_v28 = vld [vmem:[%s3875_s30 + $0x34] sm:$0xf]  ;;  %v1219_v40 = vor.u32 %v1218_v21, %v1215_v20  ;;  %v1061_v2 = vshrl.u32 %v923_v37, 16  ;;  %v4170_v21 = vld [vmem:[%s3875_s30 + $0x4] sm:$0xf] }
  0x6e   : > { %297 = vst [vmem:[#allocation2 + $0x34] sm:$0x8] %v296_v18  ;;  %v1070_v29 = vshll.u32 %v924_v28, 16  ;;  %v1074_v54 = vshrl.u32 %v924_v28, 16  ;;  %v692_v18 = vshrl.u32 %v538_v0, 16  ;;  %v1083_v28 = vshll.u32 %v925_v12, 16 }
  0x6f   : > { %v4145_v62 = vrot.slane %v1219_v40, 4  ;;  %v1063_v19 = vrot.slane %v1061_v2, 4  ;;  %v564_v40 = vshrl.u32 %v4170_v21, 16  ;;  %v1082_v44 = vrot.slane %v1080_v27, 4 }
  0x70   : > { %v1085_v45 = vrot.slane %v1083_v28, 5  ;;  %v703_v2 = vshll.u32 %v4078_v57, 16  ;;  %v574_v28 = vrot.slane %v572_v5, 7 }
  0x71   : > { %416 = vrot.lane.b32.xlu1 %v340_v38, %s3781_s4  ;;  %1300 = vrot.lane.b32.xlu0 %v1192_v39, %s3782_s5  ;;  %v326_v38 = vsel %vm3877_vm5, 0, %v325_v25  ;;  %v247_v39 = vld [vmem:[#allocation2 + $0x38] sm:$0x1]  ;;  %v1237_v25 = vrot.slane %v1235_v7, 5  ;;  %v1225_v30 = vsel %vm3919_vm8, %v4145_v62, %v4101_v36  ;;  %v566_v55 = vrot.slane %v564_v40, 7 }
  0x72   : > { %327 = vst [vmem:[#allocation2 + $0x84] sm:$0x8] %v326_v38  ;;  %v248_v15 = vsel %vm3864_vm2, 0, %v247_v39  ;;  %v695_v38 = vshll.u32 %v538_v0, 16  ;;  %v556_v39 = vshrl.u32 %v4165_v1, 16  ;;  %v1086_v0 = vor.u32 %v1085_v45, %v1082_v44  ;;  %vm4303_vm2 = vmand %vm1346_vm1, %vm943_vm6 }
  0x73   : > { %249 = vst [vmem:[#allocation2 + $0x38] sm:$0x1] %v248_v15  ;;  %v1238_v43 = vor.u32 %v1237_v25, %v1234_v24  ;;  %v4215_v7 = vld [vmem:[%s3875_s30 + $0x54] sm:$0xf] }
  0x74   : > { %v4210_v62 = vrot.slane %v556_v39, 7  ;;  %v1087_v24 = vrot.slane %v1086_v0, 4  ;;  %v724_v25 = vshrl.u32 %v4215_v7, 16  ;;  %v727_v39 = vshll.u32 %v4215_v7, 16 }
  0x75   : > { %1298 = vrot.lane.b32.xlu1 %v1187_v3, %s3782_s5  ;;  %418 = vrot.lane.b32.xlu0 %v341_v4, %s3781_s4  ;;  %v1064_v3 = vshll.u32 %v923_v37, 16  ;;  %v1229_v4 = vor.u32 %v4108_v41, %v4101_v36  ;;  %v694_v37 = vrot.slane %v692_v18, 7  ;;  %v1089_v36 = vshll.u32 %v926_v26, 16 }
  0x76   : > { %v1093_v41 = vshrl.u32 %v926_v26, 16  ;;  %v562_v12 = vrot.slane %v4210_v62, 4 }
  0x77   : > { %v1066_v20 = vrot.slane %v1064_v3, 5  ;;  %v1230_v31 = vrot.slane %v1229_v4, 4 }
  0x78   : > { %v1095_v58 = vrot.slane %v1093_v41, 4 }
  0x79   : > { %420 = vrot.lane.b32.xlu1 %v342_v13, %s3781_s4  ;;  %1304 = vrot.lane.b32.xlu0 %v1211_v10, %s3782_s5  ;;  %v4156_v10 = vrot.slane %v1070_v29, 5  ;;  %v302_v13 = vsel %vm3877_vm5, 0, %v301_v61  ;;  %v1067_v42 = vor.u32 %v1066_v20, %v1063_v19  ;;  %v697_v29 = vor.u32 %v695_v38, %v694_v37  ;;  %v4230_v19 = vld [vmem:[%s3875_s30 + $0x50] sm:$0xf] }
  0x7a   : > { %303 = vst [vmem:[#allocation2 + $0x44] sm:$0x8] %v302_v13  ;;  %v1239_v61 = vrot.slane %v1238_v43, 4  ;;  %v3783_v13 = vmov 0   ;;  %v726_v38 = vrot.slane %v724_v25, 7 }
  0x7b   : > { %v1068_v60 = vrot.slane %v1067_v42, 4  ;;  %v698_v57 = vsel %vm4203_vm14, %v690_v50, %v697_v29  ;;  %220 = vst.msk [vmem:[#allocation2] sm:$0xf] %vm219_vm15, %v3783_v13  ;;  %221 = vst.msk [vmem:[#allocation2 + $0x4] sm:$0xf] %vm219_vm15, %v3783_v13 }
  0x7c   : > { %223 = vst.msk [vmem:[#allocation2 + $0x88] sm:$0xf] %vm219_vm15, %v3783_v13  ;;  %224 = vst.msk [vmem:[#allocation2 + $0x8c] sm:$0xf] %vm219_vm15, %v3783_v13  ;;  %v729_v50 = vor.u32 %v727_v39, %v726_v38 }
  0x7d   : > { %1268 = vrot.lane.b32.xlu1 %v4072_v11, %s3782_s5  ;;  %422 = vrot.lane.b32.xlu0 %v343_v34, %s3781_s4  ;;  %v1076_v11 = vrot.slane %v1074_v54, 4  ;;  %v1248_v34 = vor.u32 %v1247_v16, %v4161_v14  ;;  %v567_v54 = vshll.u32 %v4170_v21, 16  ;;  %v1073_v20 = vsel %vm3919_vm8, %v1068_v60, %v4156_v10  ;;  %v525_v60 = vld [vmem:[%s3875_s30 + $0x10] sm:$0xf] }
  0x7e   : > { %v1244_v21 = vsel %vm3919_vm8, %v1239_v61, %v4161_v14  ;;  %v716_v14 = vshrl.u32 %v4230_v19, 16 }
  0x7f   : > { %v1077_v32 = vor.u32 %v1076_v11, %v4156_v10  ;;  %v1249_v51 = vrot.slane %v1248_v34, 4  ;;  %v569_v23 = vor.u32 %v567_v54, %v566_v55  ;;  %v559_v10 = vshll.u32 %v4165_v1, 16  ;;  %v526_v55 = vld [vmem:[%s3875_s30 + $0x14] sm:$0xf] }
  0x80   : > { %v578_v1 = vrot.slane %v574_v28, 4  ;;  %v718_v53 = vrot.slane %v716_v14, 7  ;;  %v599_v13 = vshll.u32 %v526_v55, 16 }
  0x81   : > { %1266 = vrot.lane.b32.xlu1 %v1035_v46, %s3782_s5  ;;  %1302 = vrot.lane.b32.xlu0 %v1206_v47, %s3782_s5  ;;  %v4191_v46 = vld [vmem:[%s3875_s30 + $0xc] sm:$0xf]  ;;  %v1078_v47 = vrot.slane %v1077_v32, 4  ;;  %v689_v32 = vor.u32 %v687_v8, %v4154_v9  ;;  %v719_v8 = vshll.u32 %v4230_v19, 16 }
  0x82   : > { %v580_v59 = vshrl.u32 %v4191_v46, 16  ;;  %v583_v18 = vshll.u32 %v4191_v46, 16 }
  0x84   : > { %v582_v17 = vrot.slane %v580_v59, 7 }
  0x85   : > { %1270 = vrot.lane.b32.xlu1 %v1054_v52, %s3782_s5  ;;  %1272 = vrot.lane.b32.xlu0 %v1059_v56, %s3782_s5  ;;  %v713_v52 = vor.u32 %v711_v33, %v710_v35  ;;  %v4207_v56 = vrot.slane %v1089_v36, 5  ;;  %v4259_v35 = vld [vmem:[%s3875_s30 + $0x58] sm:$0xf] }
  0x86   : > { %v585_v34 = vor.u32 %v583_v18, %v582_v17  ;;  %v732_v46 = vshrl.u32 %v4259_v35, 16  ;;  %v528_v18 = vld [vmem:[%s3875_s30 + $0x1c] sm:$0xf] }
  0x87   : > { %v714_v11 = vsel %vm4203_vm14, %v706_v48, %v713_v52  ;;  %v1096_v16 = vor.u32 %v1095_v58, %v4207_v56  ;;  %v1092_v37 = vsel %vm3919_vm8, %v1087_v24, %v4207_v56  ;;  %v722_v48 = vrot.slane %v718_v53, 4 }
  0x88   : > { %v561_v56 = vor.u32 %v559_v10, %v4210_v62  ;;  %v575_v58 = vshll.u32 %v4197_v49, 16  ;;  %v734_v59 = vrot.slane %v732_v46, 7  ;;  %v591_v10 = vshll.u32 %v525_v60, 16 }
  0x89   : > { %1306 = vrot.lane.b32.xlu1 %v1225_v30, %s3782_s5  ;;  %1308 = vrot.lane.b32.xlu0 %v1230_v31, %s3782_s5  ;;  %v544_v30 = vld [vmem:[%s3875_s30 + $0x5c] sm:$0xf]  ;;  %v705_v31 = vor.u32 %v703_v2, %v4147_v63  ;;  %v570_v63 = vsel %vm4203_vm14, %v562_v12, %v569_v23  ;;  %v1097_v9 = vrot.slane %v1096_v16, 4  ;;  %v730_v61 = vsel %vm4203_vm14, %v722_v48, %v729_v50 }
  0x8a   : > { %v740_v40 = vshrl.u32 %v544_v30, 16  ;;  %v743_v52 = vshll.u32 %v544_v30, 16  ;;  %v738_v0 = vrot.slane %v734_v59, 4  ;;  %v577_v49 = vor.u32 %v575_v58, %v574_v28 }
  0x8b   : > { %v429_v3 = vpop.permute.xlu1 %428  ;;  %v425_v4 = vpop.permute.xlu0 %424  ;;  %v615_v39 = vshll.u32 %v528_v18, 16 }
  0x8c   : > { %507 = vst.msk [vmem:[#allocation2 + $0x50] sm:$0xf] %vm488_vm11, %v429_v3  ;;  %505 = vst.msk [vmem:[#allocation2 + $0x48] sm:$0xf] %vm488_vm11, %v425_v4  ;;  %v596_v3 = vshrl.u32 %v526_v55, 16 }
  0x8d   : > { %1276 = vrot.lane.b32.xlu1 %v1078_v47, %s3782_s5  ;;  %1312 = vrot.lane.b32.xlu0 %v1249_v51, %s3782_s5  ;;  %v586_v47 = vsel %vm4203_vm14, %v578_v1, %v585_v34  ;;  %v742_v51 = vrot.slane %v740_v40, 7 }
  0x8e   : > { %v598_v12 = vrot.slane %v596_v3, 7 }
  0x8f   : > { %v431_v26 = vpop.permute.xlu1 %430  ;;  %v427_v27 = vpop.permute.xlu0 %426  ;;  %v745_v2 = vor.u32 %v743_v52, %v742_v51 }
  0x90   : > { %508 = vst.msk [vmem:[#allocation2 + $0x54] sm:$0xf] %vm488_vm11, %v431_v26  ;;  %506 = vst.msk [vmem:[#allocation2 + $0x4c] sm:$0xf] %vm488_vm11, %v427_v27  ;;  %v527_v27 = vld [vmem:[%s3875_s30 + $0x18] sm:$0xf]  ;;  %v601_v30 = vor.u32 %v599_v13, %v598_v12 }
  0x91   : > { %886 = vst.msk [vmem:[#allocation2 + $0x54] sm:$0xf] %vm843_vm12, %v714_v11  ;;  %882 = vst.msk [vmem:[#allocation2 + $0x4c] sm:$0xf] %vm843_vm12, %v698_v57  ;;  %1274 = vrot.lane.b32.xlu1 %v1073_v20, %s3782_s5  ;;  %1310 = vrot.lane.b32.xlu0 %v1244_v21, %s3782_s5  ;;  %v588_v11 = vshrl.u32 %v525_v60, 16  ;;  %v746_v57 = vsel %vm4203_vm14, %v738_v0, %v745_v2  ;;  %v721_v20 = vor.u32 %v719_v8, %v718_v53 }
  0x92   : > { %v735_v21 = vshll.u32 %v4259_v35, 16  ;;  %v604_v35 = vshrl.u32 %v527_v27, 16  ;;  %v607_v50 = vshll.u32 %v527_v27, 16  ;;  %v548_v60 = vld [vmem:[%s3875_s30 + $0x6c] sm:$0xf] }
  0x93   : > { %v883_v36 = vld [vmem:[#allocation2 + $0x50] sm:$0xf]  ;;  %v879_v41 = vld [vmem:[#allocation2 + $0x48] sm:$0xf]  ;;  %v395_v42 = vpop.permute.xlu1 %394  ;;  %v393_v43 = vpop.permute.xlu0 %392  ;;  %v590_v24 = vrot.slane %v588_v11, 7  ;;  %v772_v8 = vshrl.u32 %v548_v60, 16 }
  0x94   : > { %v884_v44 = vsel %vm4248_vm0, %v705_v31, %v883_v36  ;;  %v880_v45 = vsel %vm4248_vm0, %v689_v32, %v879_v41  ;;  %490 = vst.msk [vmem:[#allocation2 + $0xc] sm:$0xf] %vm488_vm11, %v395_v42  ;;  %489 = vst.msk [vmem:[#allocation2 + $0x8] sm:$0xf] %vm488_vm11, %v393_v43  ;;  %v612_v31 = vshrl.u32 %v528_v18, 16  ;;  %v737_v1 = vor.u32 %v735_v21, %v734_v59 }
  0x95   : > { %885 = vst [vmem:[#allocation2 + $0x50] sm:$0xf] %v884_v44  ;;  %881 = vst [vmem:[#allocation2 + $0x48] sm:$0xf] %v880_v45  ;;  %1280 = vrot.lane.b32.xlu0 %v1097_v9, %s3782_s5  ;;  %1278 = vrot.lane.b32.xlu1 %v1092_v37, %s3782_s5  ;;  %v594_v28 = vrot.slane %v590_v24, 4  ;;  %v593_v43 = vor.u32 %v591_v10, %v590_v24  ;;  %v606_v44 = vrot.slane %v604_v35, 7  ;;  %s4776_s5 = scalar_lea.hbm %s4833_s3, %s3210_s27 }
  0x96   : > { %850 = vst.msk [vmem:[#allocation2 + $0xc] sm:$0xf] %vm843_vm12, %v570_v63  ;;  %v614_v38 = vrot.slane %v612_v31, 7  ;;  %v775_v21 = vshll.u32 %v548_v60, 16  ;;  %v530_v27 = vld [vmem:[%s3875_s30 + $0x24] sm:$0xf] }
  0x97   : > { %v399_v29 = vpop.permute.xlu1 %398  ;;  %v397_v54 = vpop.permute.xlu0 %396  ;;  %v602_v37 = vsel %vm4203_vm14, %v594_v28, %v601_v30  ;;  %v610_v53 = vrot.slane %v606_v44, 4  ;;  %v529_v31 = vld [vmem:[%s3875_s30 + $0x20] sm:$0xf] }
  0x98   : > { %492 = vst.msk [vmem:[#allocation2 + $0x14] sm:$0xf] %vm488_vm11, %v399_v29  ;;  %491 = vst.msk [vmem:[#allocation2 + $0x10] sm:$0xf] %vm488_vm11, %v397_v54  ;;  %v1382_v26 = vld [vmem:[#allocation2 + $0x4c] sm:$0xf]  ;;  %v617_v46 = vor.u32 %v615_v39, %v614_v38 }
  0x99   : > { %854 = vst.msk [vmem:[#allocation2 + $0x14] sm:$0xf] %vm843_vm12, %v586_v47  ;;  %v1386_v45 = vld [vmem:[#allocation2 + $0x54] sm:$0xf]  ;;  %v4321_v47 = vld [vmem:[%s3875_s30 + $0x60] sm:$0xf] }
  0x9a   : > { %v546_v29 = vld [vmem:[%s3875_s30 + $0x64] sm:$0xf]  ;;  %v618_v58 = vsel %vm4203_vm14, %v610_v53, %v617_v46  ;;  %v748_v3 = vshrl.u32 %v4321_v47, 16  ;;  %v751_v35 = vshll.u32 %v4321_v47, 16  ;;  %v620_v38 = vshrl.u32 %v529_v31, 16 }
  0x9b   : > { %v846_v4 = vld [vmem:[#allocation2 + $0x8] sm:$0xf]  ;;  %v435_v5 = vpop.permute.xlu1 %434  ;;  %v433_v7 = vpop.permute.xlu0 %432  ;;  %v756_v59 = vshrl.u32 %v546_v29, 16 }
  0x9c   : > { %v847_v62 = vsel %vm4248_vm0, %v561_v56, %v846_v4  ;;  %510 = vst.msk [vmem:[#allocation2 + $0x5c] sm:$0xf] %vm488_vm11, %v435_v5  ;;  %509 = vst.msk [vmem:[#allocation2 + $0x58] sm:$0xf] %vm488_vm11, %v433_v7  ;;  %v609_v4 = vor.u32 %v607_v50, %v606_v44  ;;  %v4337_v7 = vld [vmem:[%s3875_s30 + $0x68] sm:$0xf] }
  0x9d   : > { %848 = vst [vmem:[#allocation2 + $0x8] sm:$0xf] %v847_v62  ;;  %890 = vst.msk [vmem:[#allocation2 + $0x5c] sm:$0xf] %vm843_vm12, %v730_v61  ;;  %v1350_v56 = vld [vmem:[#allocation2 + $0xc] sm:$0xf] }
  0x9e   : > { %v758_v62 = vrot.slane %v756_v59, 7  ;;  %v750_v13 = vrot.slane %v748_v3, 7  ;;  %v622_v53 = vrot.slane %v620_v38, 7 }
  0x9f   : > { %v851_v23 = vld [vmem:[#allocation2 + $0x10] sm:$0xf]  ;;  %v439_v16 = vpop.permute.xlu1 %438  ;;  %v437_v17 = vpop.permute.xlu0 %436 }
  0xa0   : > { %v852_v19 = vsel %vm4248_vm0, %v577_v49, %v851_v23  ;;  %512 = vst.msk [vmem:[#allocation2 + $0x64] sm:$0xf] %vm488_vm11, %v439_v16  ;;  %511 = vst.msk [vmem:[#allocation2 + $0x60] sm:$0xf] %vm488_vm11, %v437_v17  ;;  %v759_v49 = vshll.u32 %v546_v29, 16  ;;  %v764_v23 = vshrl.u32 %v4337_v7, 16 }
  0xa1   : > { %853 = vst [vmem:[#allocation2 + $0x10] sm:$0xf] %v852_v19  ;;  %894 = vst.msk [vmem:[#allocation2 + $0x64] sm:$0xf] %vm843_vm12, %v746_v57  ;;  %v1354_v17 = vld [vmem:[#allocation2 + $0x14] sm:$0xf] }
  0xa2   : > { %v754_v18 = vrot.slane %v750_v13, 4  ;;  %v761_v19 = vor.u32 %v759_v49, %v758_v62  ;;  %v766_v30 = vrot.slane %v764_v23, 7  ;;  %v626_v50 = vrot.slane %v622_v53, 4 }
  0xa3   : > { %v887_v32 = vld [vmem:[#allocation2 + $0x58] sm:$0xf]  ;;  %v401_v14 = vpop.permute.xlu1 %400  ;;  %v1285_v63 = vpop.permute.xlu0 %1284 }
  0xa4   : > { %v888_v9 = vsel %vm4248_vm0, %v721_v20, %v887_v32  ;;  %493 = vst.msk [vmem:[#allocation2 + $0x18] sm:$0xf] %vm488_vm11, %v401_v14  ;;  %v1383_v34 = vsel %vm4303_vm2, %v1285_v63, %v1382_v26  ;;  %v774_v20 = vrot.slane %v772_v8, 7  ;;  %v762_v32 = vsel %vm4203_vm14, %v754_v18, %v761_v19  ;;  %v1390_v47 = vld [vmem:[#allocation2 + $0x5c] sm:$0xf] }
  0xa5   : > { %889 = vst [vmem:[#allocation2 + $0x58] sm:$0xf] %v888_v9  ;;  %1384 = vst [vmem:[#allocation2 + $0x4c] sm:$0xf] %v1383_v34  ;;  %v770_v10 = vrot.slane %v766_v30, 4  ;;  %v628_v63 = vshrl.u32 %v530_v27, 16 }
  0xa6   : > { %v777_v14 = vor.u32 %v775_v21, %v774_v20 }
  0xa7   : > { %v891_v40 = vld [vmem:[#allocation2 + $0x60] sm:$0xf]  ;;  %v1283_v36 = vpop.permute.xlu1 %1282  ;;  %v403_v41 = vpop.permute.xlu0 %402 }
  0xa8   : > { %v892_v42 = vsel %vm4248_vm0, %v737_v1, %v891_v40  ;;  %1381 = vst.msk [vmem:[#allocation2 + $0x48] sm:$0xf] %vm1346_vm1, %v1283_v36  ;;  %v778_v39 = vsel %vm4203_vm14, %v770_v10, %v777_v14  ;;  %v767_v40 = vshll.u32 %v4337_v7, 16  ;;  %v630_v36 = vrot.slane %v628_v63, 7  ;;  %v1394_v49 = vld [vmem:[#allocation2 + $0x64] sm:$0xf] }
  0xa9   : > { %494 = vst.msk [vmem:[#allocation2 + $0x1c] sm:$0xf] %vm488_vm11, %v403_v41  ;;  %893 = vst [vmem:[#allocation2 + $0x60] sm:$0xf] %v892_v42  ;;  %v631_v41 = vshll.u32 %v530_v27, 16 }
  0xaa   : > { %858 = vst.msk [vmem:[#allocation2 + $0x1c] sm:$0xf] %vm843_vm12, %v602_v37  ;;  %v532_v42 = vld [vmem:[%s3875_s30 + $0x2c] sm:$0xf]  ;;  %v4399_v14 = vld [vmem:[%s3875_s30 + $0x78] sm:$0xf] }
  0xab   : > { %v855_v48 = vld [vmem:[#allocation2 + $0x18] sm:$0xf]  ;;  %v405_v51 = vpop.permute.xlu1 %404  ;;  %v1289_v52 = vpop.permute.xlu0 %1288 }
  0xac   : > { %v856_v54 = vsel %vm4248_vm0, %v593_v43, %v855_v48  ;;  %495 = vst.msk [vmem:[#allocation2 + $0x20] sm:$0xf] %vm488_vm11, %v405_v51  ;;  %v1387_v55 = vsel %vm4303_vm2, %v1289_v52, %v1386_v45  ;;  %v753_v45 = vor.u32 %v751_v35, %v750_v13  ;;  %v531_v48 = vld [vmem:[%s3875_s30 + $0x28] sm:$0xf]  ;;  %v633_v51 = vor.u32 %v631_v41, %v630_v36 }
  0xad   : > { %857 = vst [vmem:[#allocation2 + $0x18] sm:$0xf] %v856_v54  ;;  %1388 = vst [vmem:[#allocation2 + $0x54] sm:$0xf] %v1387_v55  ;;  %v644_v52 = vshrl.u32 %v532_v42, 16  ;;  %v623_v54 = vshll.u32 %v529_v31, 16 }
  0xae   : > { %v636_v60 = vshrl.u32 %v531_v48, 16  ;;  %v639_v13 = vshll.u32 %v531_v48, 16 }
  0xaf   : > { %v1253_v61 = vpop.permute.xlu1 %1252  ;;  %v407_v0 = vpop.permute.xlu0 %406  ;;  %v3524_v2 = vld [vmem:[#allocation2 + $0x48] sm:$0xff]   ;;  %v625_v7 = vor.u32 %v623_v54, %v622_v53 }
  0xb0   : > { %v1351_v5 = vsel %vm4303_vm2, %v1253_v61, %v1350_v56  ;;  %496 = vst.msk [vmem:[#allocation2 + $0x24] sm:$0xf] %vm488_vm11, %v407_v0  ;;  %3375 = vmatprep.mubr.msk.bf16.mxu1 %vm1575_vm3, %v3524_v2  ;;  %v634_v61 = vsel %vm4203_vm14, %v626_v50, %v633_v51  ;;  %v646_v0 = vrot.slane %v644_v52, 7  ;;  %v647_v2 = vshll.u32 %v532_v42, 16  ;;  %v533_v50 = vld [vmem:[%s3875_s30 + $0x30] sm:$0xf] }
  0xb1   : > { %1352 = vst [vmem:[#allocation2 + $0xc] sm:$0xf] %v1351_v5  ;;  %862 = vst.msk [vmem:[#allocation2 + $0x24] sm:$0xf] %vm843_vm12, %v618_v58  ;;  %v769_v58 = vor.u32 %v767_v40, %v766_v30  ;;  %v638_v62 = vrot.slane %v636_v60, 7  ;;  %v652_v60 = vshrl.u32 %v533_v50, 16 }
  0xb2   : > { %v1358_v20 = vld [vmem:[#allocation2 + $0x1c] sm:$0xf] }
  0xb3   : > { %v859_v11 = vld [vmem:[#allocation2 + $0x20] sm:$0xf]  ;;  %v1251_v57 = vpop.permute.xlu1 %1250  ;;  %v1287_v12 = vpop.permute.xlu0 %1286  ;;  %v642_v8 = vrot.slane %v638_v62, 4 }
  0xb4   : > { %v860_v16 = vsel %vm4248_vm0, %v609_v4, %v859_v11  ;;  %1347 = vst.msk [vmem:[#allocation2 + $0x8] sm:$0xf] %vm1346_vm1, %v1251_v57  ;;  %1385 = vst.msk [vmem:[#allocation2 + $0x50] sm:$0xf] %vm1346_vm1, %v1287_v12  ;;  %v649_v11 = vor.u32 %v647_v2, %v646_v0  ;;  %v4383_v57 = vld [vmem:[%s3875_s30 + $0x70] sm:$0xf] }
  0xb5   : > { %861 = vst [vmem:[#allocation2 + $0x20] sm:$0xf] %v860_v16  ;;  %v780_v31 = vshrl.u32 %v4383_v57, 16  ;;  %v799_v2 = vshll.u32 %v4399_v14, 16 }
  0xb6   : > { %v650_v21 = vsel %vm4203_vm14, %v642_v8, %v649_v11  ;;  %v535_v11 = vld [vmem:[%s3875_s30 + $0x38] sm:$0xf] }
  0xb7   : > { %v1255_v24 = vpop.permute.xlu1 %1254  ;;  %v1257_v26 = vpop.permute.xlu0 %1256  ;;  %v782_v38 = vrot.slane %v780_v31, 7 }
  0xb8   : > { %1353 = vst.msk [vmem:[#allocation2 + $0x10] sm:$0xf] %vm1346_vm1, %v1255_v24  ;;  %v1355_v28 = vsel %vm4303_vm2, %v1257_v26, %v1354_v17  ;;  %v550_v17 = vld [vmem:[%s3875_s30 + $0x74] sm:$0xf]  ;;  %v552_v26 = vld [vmem:[%s3875_s30 + $0x7c] sm:$0xf] }
  0xb9   : > { %1356 = vst [vmem:[#allocation2 + $0x14] sm:$0xf] %v1355_v28  ;;  %v788_v24 = vshrl.u32 %v550_v17, 16  ;;  %v1362_v36 = vld [vmem:[#allocation2 + $0x24] sm:$0xf]  ;;  %v786_v41 = vrot.slane %v782_v38, 4 }
  0xbb   : > { %v443_v9 = vpop.permute.xlu1 %442  ;;  %v441_v1 = vpop.permute.xlu0 %440  ;;  %v3526_v34 = vld [vmem:[#allocation2 + $0x8] sm:$0xff]   ;;  %v3527_v37 = vld [vmem:[#allocation2 + $0x50] sm:$0xff]   ;;  %v790_v63 = vrot.slane %v788_v24, 7  ;;  %v668_v24 = vshrl.u32 %v535_v11, 16 }
  0xbc   : > { %514 = vst.msk [vmem:[#allocation2 + $0x6c] sm:$0xf] %vm488_vm11, %v443_v9  ;;  %513 = vst.msk [vmem:[#allocation2 + $0x68] sm:$0xf] %vm488_vm11, %v441_v1  ;;  %3359 = vmatprep.mubr.msk.bf16.mxu0 %vm1575_vm3, %v3526_v34  ;;  %3376 = vmatmul.mubr.msk.bf16.vlgmr.msra.gmra.mxu1 %vm1575_vm3, %v3527_v37  ;;  %v791_v9 = vshll.u32 %v550_v17, 16  ;;  %v804_v1 = vshrl.u32 %v552_v26, 16 }
  0xbd   : > { %898 = vst.msk [vmem:[#allocation2 + $0x6c] sm:$0xf] %vm843_vm12, %v762_v32  ;;  %3392 = vmatpush3.bf16.msra.mxu1 %v4173_v6  ;;  %v641_v32 = vor.u32 %v639_v13, %v638_v62  ;;  %v654_v62 = vrot.slane %v652_v60, 7  ;;  %v3545_v25 = vld [vmem:[#allocation2 + $0x8] sm:$0xff]  }
  0xbe   : > { %v793_v42 = vor.u32 %v791_v9, %v790_v63  ;;  %v670_v63 = vrot.slane %v668_v24, 7 }
  0xbf   : > { %v447_v43 = vpop.permute.xlu1 %446  ;;  %v445_v44 = vpop.permute.xlu0 %444 }
  0xc0   : > { %516 = vst.msk [vmem:[#allocation2 + $0x74] sm:$0xf] %vm488_vm11, %v447_v43  ;;  %515 = vst.msk [vmem:[#allocation2 + $0x70] sm:$0xf] %vm488_vm11, %v445_v44  ;;  %v3528_v46 = vld [vmem:[#allocation2 + $0x10] sm:$0xff]   ;;  %v806_v43 = vrot.slane %v804_v1, 7  ;;  %v794_v51 = vsel %vm4203_vm14, %v786_v41, %v793_v42 }
  0xc1   : > { %902 = vst.msk [vmem:[#allocation2 + $0x74] sm:$0xf] %vm843_vm12, %v778_v39  ;;  %3360 = vmatmul.mubr.msk.bf16.vlgmr.msra.gmra.mxu0 %vm1575_vm3, %v3528_v46  ;;  %v796_v39 = vshrl.u32 %v4399_v14, 16  ;;  %v807_v44 = vshll.u32 %v552_v26, 16  ;;  %v534_v46 = vld [vmem:[%s3875_s30 + $0x34] sm:$0xf] }
  0xc2   : > { %3426 = vmatpush3.bf16.msra.mxu0 %v4176_v22  ;;  %v660_v54 = vshrl.u32 %v534_v46, 16  ;;  %v674_v1 = vrot.slane %v670_v63, 4 }
  0xc3   : > { %v895_v29 = vld [vmem:[#allocation2 + $0x68] sm:$0xf]  ;;  %v409_v55 = vpop.permute.xlu1 %408  ;;  %v1293_v6 = vpop.permute.xlu0 %1292  ;;  %v798_v48 = vrot.slane %v796_v39, 7 }
  0xc4   : > { %v896_v56 = vsel %vm4248_vm0, %v753_v45, %v895_v29  ;;  %497 = vst.msk [vmem:[#allocation2 + $0x28] sm:$0xf] %vm488_vm11, %v409_v55  ;;  %v1391_v59 = vsel %vm4303_vm2, %v1293_v6, %v1390_v47  ;;  %v809_v29 = vor.u32 %v807_v44, %v806_v43  ;;  %v1398_v8 = vld [vmem:[#allocation2 + $0x6c] sm:$0xf] }
  0xc5   : > { %897 = vst [vmem:[#allocation2 + $0x68] sm:$0xf] %v896_v56  ;;  %1392 = vst [vmem:[#allocation2 + $0x5c] sm:$0xf] %v1391_v59  ;;  %v802_v52 = vrot.slane %v798_v48, 4 }
  0xc7   : > { %v899_v3 = vld [vmem:[#allocation2 + $0x70] sm:$0xf]  ;;  %v1291_v22 = vpop.permute.xlu1 %1290  ;;  %v411_v4 = vpop.permute.xlu0 %410  ;;  %v810_v0 = vsel %vm4203_vm14, %v802_v52, %v809_v29 }
  0xc8   : > { %v900_v5 = vsel %vm4248_vm0, %v769_v58, %v899_v3  ;;  %1389 = vst.msk [vmem:[#allocation2 + $0x58] sm:$0xf] %vm1346_vm1, %v1291_v22  ;;  %v783_v58 = vshll.u32 %v4383_v57, 16  ;;  %v662_v3 = vrot.slane %v660_v54, 7  ;;  %v663_v22 = vshll.u32 %v534_v46, 16 }
  0xc9   : > { %498 = vst.msk [vmem:[#allocation2 + $0x2c] sm:$0xf] %vm488_vm11, %v411_v4  ;;  %901 = vst [vmem:[#allocation2 + $0x70] sm:$0xf] %v900_v5  ;;  %v658_v57 = vrot.slane %v654_v62, 4 }
  0xca   : > { %866 = vst.msk [vmem:[#allocation2 + $0x2c] sm:$0xf] %vm843_vm12, %v634_v61  ;;  %v536_v61 = vld [vmem:[%s3875_s30 + $0x3c] sm:$0xf]  ;;  %v1402_v9 = vld [vmem:[#allocation2 + $0x74] sm:$0xf] }
  0xcb   : > { %v863_v12 = vld [vmem:[#allocation2 + $0x28] sm:$0xf]  ;;  %v413_v23 = vpop.permute.xlu1 %412  ;;  %v1297_v16 = vpop.permute.xlu0 %1296  ;;  %v676_v13 = vshrl.u32 %v536_v61, 16 }
  0xcc   : > { %v864_v18 = vsel %vm4248_vm0, %v625_v7, %v863_v12  ;;  %499 = vst.msk [vmem:[#allocation2 + $0x30] sm:$0xf] %vm488_vm11, %v413_v23  ;;  %v1395_v19 = vsel %vm4303_vm2, %v1297_v16, %v1394_v49  ;;  %v785_v7 = vor.u32 %v783_v58, %v782_v38  ;;  %v665_v12 = vor.u32 %v663_v22, %v662_v3 }
  0xcd   : > { %865 = vst [vmem:[#allocation2 + $0x28] sm:$0xf] %v864_v18  ;;  %1396 = vst [vmem:[#allocation2 + $0x64] sm:$0xf] %v1395_v19  ;;  %v655_v16 = vshll.u32 %v533_v50, 16 }
  0xce   : > { %v666_v26 = vsel %vm4203_vm14, %v658_v57, %v665_v12  ;;  %v3544_v12 = vld [vmem:[#allocation2] sm:$0xff]  }
  0xcf   : > { %v1261_v27 = vpop.permute.xlu1 %1260  ;;  %v415_v28 = vpop.permute.xlu0 %414  ;;  %v3529_v30 = vld [vmem:[#allocation2 + $0x58] sm:$0xff]   ;;  %v657_v14 = vor.u32 %v655_v16, %v654_v62 }
  0xd0   : > { %v1359_v10 = vsel %vm4303_vm2, %v1261_v27, %v1358_v20  ;;  %500 = vst.msk [vmem:[#allocation2 + $0x34] sm:$0xf] %vm488_vm11, %v415_v28  ;;  %3379 = vmatprep.mubr.msk.bf16.mxu1 %vm1575_vm3, %v3529_v30  ;;  %v801_v20 = vor.u32 %v799_v2, %v798_v48  ;;  %v678_v27 = vrot.slane %v676_v13, 7  ;;  %v679_v28 = vshll.u32 %v536_v61, 16 }
  0xd1   : > { %1360 = vst [vmem:[#allocation2 + $0x1c] sm:$0xf] %v1359_v10  ;;  %870 = vst.msk [vmem:[#allocation2 + $0x34] sm:$0xf] %vm843_vm12, %v650_v21  ;;  %v1366_v41 = vld [vmem:[#allocation2 + $0x2c] sm:$0xf] }
  0xd3   : > { %v867_v34 = vld [vmem:[#allocation2 + $0x30] sm:$0xf]  ;;  %v1259_v35 = vpop.permute.xlu1 %1258  ;;  %v1295_v37 = vpop.permute.xlu0 %1294 }
  0xd4   : > { %v868_v40 = vsel %vm4248_vm0, %v641_v32, %v867_v34  ;;  %1357 = vst.msk [vmem:[#allocation2 + $0x18] sm:$0xf] %vm1346_vm1, %v1259_v35  ;;  %1393 = vst.msk [vmem:[#allocation2 + $0x60] sm:$0xf] %vm1346_vm1, %v1295_v37  ;;  %v681_v34 = vor.u32 %v679_v28, %v678_v27  ;;  %v671_v37 = vshll.u32 %v535_v11, 16 }
  0xd5   : > { %869 = vst [vmem:[#allocation2 + $0x30] sm:$0xf] %v868_v40 }
  0xd6   : > { %v682_v42 = vsel %vm4203_vm14, %v674_v1, %v681_v34  ;;  %v3561_v1 = vld [vmem:[#allocation2 + $0x48] sm:$0xff]   ;;  %v3562_v34 = vld [vmem:[#allocation2 + $0x50] sm:$0xff]  }
  0xd7   : > { %v1263_v45 = vpop.permute.xlu1 %1262  ;;  %v1265_v53 = vpop.permute.xlu0 %1264 }
  0xd8   : > { %1361 = vst.msk [vmem:[#allocation2 + $0x20] sm:$0xf] %vm1346_vm1, %v1263_v45  ;;  %v1363_v47 = vsel %vm4303_vm2, %v1265_v53, %v1362_v36  ;;  %v673_v53 = vor.u32 %v671_v37, %v670_v63  ;;  %v3559_v63 = vld [vmem:[#allocation2 + $0x48] sm:$0xff]  }
  0xd9   : > { %1364 = vst [vmem:[#allocation2 + $0x24] sm:$0xf] %v1363_v47 }
  0xdb   : > { %v451_v55 = vpop.permute.xlu1 %450  ;;  %v449_v6 = vpop.permute.xlu0 %448  ;;  %v3530_v56 = vld [vmem:[#allocation2 + $0x18] sm:$0xff]   ;;  %v3531_v59 = vld [vmem:[#allocation2 + $0x60] sm:$0xff]  }
  0xdc   : > { %518 = vst.msk [vmem:[#allocation2 + $0x7c] sm:$0xf] %vm488_vm11, %v451_v55  ;;  %517 = vst.msk [vmem:[#allocation2 + $0x78] sm:$0xf] %vm488_vm11, %v449_v6  ;;  %3363 = vmatprep.mubr.msk.bf16.mxu0 %vm1575_vm3, %v3530_v56  ;;  %3380 = vmatmul.mubr.msk.bf16.gmra.mxu1 %vm1575_vm3, %v3531_v59  ;;  %v3564_v37 = vld [vmem:[#allocation2 + $0x60] sm:$0xff]  }
  0xdd   : > { %906 = vst.msk [vmem:[#allocation2 + $0x7c] sm:$0xf] %vm843_vm12, %v794_v51  ;;  %v1370_v51 = vld [vmem:[#allocation2 + $0x34] sm:$0xf] }
  0xdf   : > { %v455_v4 = vpop.permute.xlu1 %454  ;;  %v453_v5 = vpop.permute.xlu0 %452 }
  0xe0   : > { %520 = vst.msk [vmem:[#allocation2 + $0x84] sm:$0xf] %vm488_vm11, %v455_v4  ;;  %519 = vst.msk [vmem:[#allocation2 + $0x80] sm:$0xf] %vm488_vm11, %v453_v5  ;;  %v3532_v49 = vld [vmem:[#allocation2 + $0x20] sm:$0xff]  }
  0xe1   : > { %910 = vst.msk [vmem:[#allocation2 + $0x84] sm:$0xf] %vm843_vm12, %v810_v0  ;;  %3364 = vmatmul.mubr.msk.bf16.gmra.mxu0 %vm1575_vm3, %v3532_v49  ;;  %v3550_v24 = vld [vmem:[#allocation2 + $0x20] sm:$0xff]  }
  0xe3   : > { %v903_v23 = vld [vmem:[#allocation2 + $0x78] sm:$0xf]  ;;  %v417_v17 = vpop.permute.xlu1 %416  ;;  %v1301_v18 = vpop.permute.xlu0 %1300 }
  0xe4   : > { %v904_v19 = vsel %vm4248_vm0, %v785_v7, %v903_v23  ;;  %501 = vst.msk [vmem:[#allocation2 + $0x38] sm:$0xf] %vm488_vm11, %v417_v17  ;;  %v1399_v21 = vsel %vm4303_vm2, %v1301_v18, %v1398_v8  ;;  %v1406_v55 = vld [vmem:[#allocation2 + $0x7c] sm:$0xf]  ;;  %v3543_v17 = vld [vmem:[#allocation2 + $0x10] sm:$0xff]  }
  0xe5   : > { %905 = vst [vmem:[#allocation2 + $0x78] sm:$0xf] %v904_v19  ;;  %1400 = vst [vmem:[#allocation2 + $0x6c] sm:$0xf] %v1399_v21  ;;  %v3546_v18 = vld [vmem:[#allocation2 + $0x10] sm:$0xff]   ;;  %v3547_v19 = vld [vmem:[#allocation2 + $0x18] sm:$0xff]  }
  0xe6   : > { %v3549_v21 = vld [vmem:[#allocation2 + $0x18] sm:$0xff]  }
  0xe7   : > { %v907_v30 = vld [vmem:[#allocation2 + $0x80] sm:$0xf]  ;;  %v1299_v31 = vpop.permute.xlu1 %1298  ;;  %v419_v32 = vpop.permute.xlu0 %418 }
  0xe8   : > { %v908_v10 = vsel %vm4248_vm0, %v801_v20, %v907_v30  ;;  %1397 = vst.msk [vmem:[#allocation2 + $0x68] sm:$0xf] %vm1346_vm1, %v1299_v31  ;;  %v1410_v60 = vld [vmem:[#allocation2 + $0x84] sm:$0xf] }
  0xe9   : > { %502 = vst.msk [vmem:[#allocation2 + $0x3c] sm:$0xf] %vm488_vm11, %v419_v32  ;;  %909 = vst [vmem:[#allocation2 + $0x80] sm:$0xf] %v908_v10  ;;  %v3548_v20 = vld [vmem:[#allocation2 + $0x20] sm:$0xff]  }
  0xea   : > { %874 = vst.msk [vmem:[#allocation2 + $0x3c] sm:$0xf] %vm843_vm12, %v666_v26 }
  0xeb   : > { %v871_v35 = vld [vmem:[#allocation2 + $0x38] sm:$0xf]  ;;  %v421_v38 = vpop.permute.xlu1 %420  ;;  %v1305_v39 = vpop.permute.xlu0 %1304 }
  0xec   : > { %v872_v40 = vsel %vm4248_vm0, %v657_v14, %v871_v35  ;;  %503 = vst.msk [vmem:[#allocation2 + $0x40] sm:$0xf] %vm488_vm11, %v421_v38  ;;  %v1403_v36 = vsel %vm4303_vm2, %v1305_v39, %v1402_v9  ;;  %v3560_v9 = vld [vmem:[#allocation2 + $0x50] sm:$0xff]   ;;  %v3563_v35 = vld [vmem:[#allocation2 + $0x58] sm:$0xff]   ;;  %v3566_v39 = vld [vmem:[#allocation2 + $0x60] sm:$0xff]  }
  0xed   : > { %873 = vst [vmem:[#allocation2 + $0x38] sm:$0xf] %v872_v40  ;;  %1404 = vst [vmem:[#allocation2 + $0x74] sm:$0xf] %v1403_v36  ;;  %v3565_v38 = vld [vmem:[#allocation2 + $0x58] sm:$0xff]  }
  0xef   : > { %v1269_v43 = vpop.permute.xlu1 %1268  ;;  %v423_v44 = vpop.permute.xlu0 %422  ;;  %v3533_v45 = vld [vmem:[#allocation2 + $0x68] sm:$0xff]  }
  0xf0   : > { %v1367_v46 = vsel %vm4303_vm2, %v1269_v43, %v1366_v41  ;;  %504 = vst.msk [vmem:[#allocation2 + $0x44] sm:$0xf] %vm488_vm11, %v423_v44  ;;  %3383 = vmatprep.mubr.msk.bf16.mxu1 %vm1575_vm3, %v3533_v45  ;;  %v3567_v40 = vld [vmem:[#allocation2 + $0x68] sm:$0xff]  }
  0xf1   : > { %1368 = vst [vmem:[#allocation2 + $0x2c] sm:$0xf] %v1367_v46  ;;  %878 = vst.msk [vmem:[#allocation2 + $0x44] sm:$0xf] %vm843_vm12, %v682_v42  ;;  %v1374_v61 = vld [vmem:[#allocation2 + $0x3c] sm:$0xf] }
  0xf2   : > { %v3569_v41 = vld [vmem:[#allocation2 + $0x68] sm:$0xff]  }
  0xf3   : > { %v875_v47 = vld [vmem:[#allocation2 + $0x40] sm:$0xf]  ;;  %v1267_v48 = vpop.permute.xlu1 %1266  ;;  %v1303_v50 = vpop.permute.xlu0 %1302 }
  0xf4   : > { %v876_v15 = vsel %vm4248_vm0, %v673_v53, %v875_v47  ;;  %1365 = vst.msk [vmem:[#allocation2 + $0x28] sm:$0xf] %vm1346_vm1, %v1267_v48  ;;  %1401 = vst.msk [vmem:[#allocation2 + $0x70] sm:$0xf] %vm1346_vm1, %v1303_v50  ;;  %v3574_v53 = vld [vmem:[#allocation2 + $0x88] sm:$0xff]  }
  0xf5   : > { %877 = vst [vmem:[#allocation2 + $0x40] sm:$0xf] %v876_v15 }
  0xf7   : > { %v1271_v52 = vpop.permute.xlu1 %1270  ;;  %v1273_v29 = vpop.permute.xlu0 %1272 }
  0xf8   : > { %1369 = vst.msk [vmem:[#allocation2 + $0x30] sm:$0xf] %vm1346_vm1, %v1271_v52  ;;  %v1371_v54 = vsel %vm4303_vm2, %v1273_v29, %v1370_v51  ;;  %v1378_v49 = vld [vmem:[#allocation2 + $0x44] sm:$0xf] }
  0xf9   : > { %1372 = vst [vmem:[#allocation2 + $0x34] sm:$0xf] %v1371_v54 }
  0xfb   : > { %v1307_v6 = vpop.permute.xlu1 %1306  ;;  %v1309_v56 = vpop.permute.xlu0 %1308  ;;  %v3536_v58 = vld [vmem:[#allocation2 + $0x28] sm:$0xff]   ;;  %v3537_v59 = vld [vmem:[#allocation2 + $0x70] sm:$0xff]  }
  0xfc   : > { %1405 = vst.msk [vmem:[#allocation2 + $0x78] sm:$0xf] %vm1346_vm1, %v1307_v6  ;;  %v1407_v33 = vsel %vm4303_vm2, %v1309_v56, %v1406_v55  ;;  %3367 = vmatprep.mubr.msk.bf16.mxu0 %vm1575_vm3, %v3536_v58  ;;  %3384 = vmatmul.mubr.msk.bf16.gmra.mxu1 %vm1575_vm3, %v3537_v59  ;;  %v3551_v26 = vld [vmem:[#allocation2 + $0x28] sm:$0xff]   ;;  %v3568_v36 = vld [vmem:[#allocation2 + $0x70] sm:$0xff]  }
  0xfd   : > { %1408 = vst [vmem:[#allocation2 + $0x7c] sm:$0xf] %v1407_v33  ;;  %v3553_v28 = vld [vmem:[#allocation2 + $0x28] sm:$0xff]   ;;  %v3570_v42 = vld [vmem:[#allocation2 + $0x70] sm:$0xff]  }
  0xff   : > { %v1277_v0 = vpop.permute.xlu1 %1276  ;;  %v1313_v2 = vpop.permute.xlu0 %1312 }
 0x100   : > { %v1375_v3 = vsel %vm4303_vm2, %v1277_v0, %v1374_v61  ;;  %v1411_v22 = vsel %vm4303_vm2, %v1313_v2, %v1410_v60  ;;  %v3538_v4 = vld [vmem:[#allocation2 + $0x30] sm:$0xff]  }
 0x101   : > { %1376 = vst [vmem:[#allocation2 + $0x3c] sm:$0xf] %v1375_v3  ;;  %1412 = vst [vmem:[#allocation2 + $0x84] sm:$0xf] %v1411_v22  ;;  %3368 = vmatmul.mubr.msk.bf16.gmra.mxu0 %vm1575_vm3, %v3538_v4  ;;  %v3552_v27 = vld [vmem:[#allocation2 + $0x30] sm:$0xff]  }
 0x102   : > { %v3554_v30 = vld [vmem:[#allocation2 + $0x30] sm:$0xff]  }
 0x103   : > { %v1275_v5 = vpop.permute.xlu1 %1274  ;;  %v1311_v7 = vpop.permute.xlu0 %1310 }
 0x104   : > { %1373 = vst.msk [vmem:[#allocation2 + $0x38] sm:$0xf] %vm1346_vm1, %v1275_v5  ;;  %1409 = vst.msk [vmem:[#allocation2 + $0x80] sm:$0xf] %vm1346_vm1, %v1311_v7  ;;  %v3539_v62 = vld [vmem:[#allocation2 + $0x78] sm:$0xff]  }
 0x105   : > { %3387 = vmatprep.mubr.msk.bf16.mxu1 %vm1575_vm3, %v3539_v62  ;;  %v3571_v43 = vld [vmem:[#allocation2 + $0x78] sm:$0xff]  }
 0x106   : > { %v3573_v45 = vld [vmem:[#allocation2 + $0x78] sm:$0xff]  }
 0x107   : > { %v1281_v8 = vpop.permute.xlu0 %1280  ;;  %v1279_v11 = vpop.permute.xlu1 %1278 }
 0x108   : > { %v1379_v57 = vsel %vm4303_vm2, %v1281_v8, %v1378_v49  ;;  %1377 = vst.msk [vmem:[#allocation2 + $0x40] sm:$0xf] %vm1346_vm1, %v1279_v11 }
 0x109   : > { %1380 = vst [vmem:[#allocation2 + $0x44] sm:$0xf] %v1379_v57 }
 0x10b   : > { %v3540_v13 = vld [vmem:[#allocation2 + $0x38] sm:$0xff]   ;;  %v3541_v23 = vld [vmem:[#allocation2 + $0x80] sm:$0xff]  }
 0x10c   : > { %3371 = vmatprep.mubr.msk.bf16.mxu0 %vm1575_vm3, %v3540_v13  ;;  %3388 = vmatmul.mubr.msk.bf16.gmra.mxu1 %vm1575_vm3, %v3541_v23  ;;  %v3555_v31 = vld [vmem:[#allocation2 + $0x38] sm:$0xff]   ;;  %v3572_v44 = vld [vmem:[#allocation2 + $0x80] sm:$0xff]  }
 0x10d   : > { %3393 = vmatprep.mubr.msk.bf16.mxu1 %vm1575_vm3, %v3544_v12  ;;  %v3557_v10 = vld [vmem:[#allocation2 + $0x38] sm:$0xff]  }
 0x110   : > { %v3542_v16 = vld [vmem:[#allocation2 + $0x40] sm:$0xff]  }
 0x111   : > { %3372 = vmatmul.mubr.msk.bf16.gmra.mxu0 %vm1575_vm3, %v3542_v16  ;;  %v3556_v32 = vld [vmem:[#allocation2 + $0x40] sm:$0xff]  }
 0x112   : > { %3427 = vmatprep.mubr.msk.bf16.mxu0 %vm1575_vm3, %v3543_v17  ;;  %v3558_v14 = vld [vmem:[#allocation2 + $0x40] sm:$0xff]  }
 0x114   : > { %3394 = vmatmul.mubr.msk.bf16.vlgmr.msra.gmra.mxu1 %vm1575_vm3, %v3545_v25 }
 0x115   : > { %3397 = vmatprep.mubr.msk.bf16.mxu1 %vm1575_vm3, %v3546_v18 }
 0x119   : > { %3428 = vmatmul.mubr.msk.bf16.vlgmr.msra.gmra.mxu0 %vm1575_vm3, %v3547_v19  ;;  %v4563_v19 = vld [vmem:[%s4832_s2] ss:$0 sm:$0xff] }
 0x11a   : > { %3431 = vmatprep.mubr.msk.bf16.mxu0 %vm1575_vm3, %v3548_v20 }
 0x11c   : > { %3398 = vmatmul.mubr.msk.bf16.gmra.mxu1 %vm1575_vm3, %v3549_v21 }
 0x11d   : > { %3401 = vmatprep.mubr.msk.bf16.mxu1 %vm1575_vm3, %v3550_v24 }
 0x121   : > { %3432 = vmatmul.mubr.msk.bf16.gmra.mxu0 %vm1575_vm3, %v3551_v26 }
 0x122   : > { %3435 = vmatprep.mubr.msk.bf16.mxu0 %vm1575_vm3, %v3552_v27 }
 0x124   : > { %3402 = vmatmul.mubr.msk.bf16.gmra.mxu1 %vm1575_vm3, %v3553_v28 }
 0x125   : > { %3405 = vmatprep.mubr.msk.bf16.mxu1 %vm1575_vm3, %v3554_v30 }
 0x129   : > { %3436 = vmatmul.mubr.msk.bf16.gmra.mxu0 %vm1575_vm3, %v3555_v31 }
 0x12a   : > { %3439 = vmatprep.mubr.msk.bf16.mxu0 %vm1575_vm3, %v3556_v32 }
 0x12c   : > { %3406 = vmatmul.mubr.msk.bf16.gmra.mxu1 %vm1575_vm3, %v3557_v10 }
 0x12d   : > { %3409 = vmatprep.mubr.msk.bf16.mxu1 %vm1575_vm3, %v3558_v14 }
 0x131   : > { %3440 = vmatmul.mubr.msk.bf16.gmra.mxu0 %vm1575_vm3, %v3559_v63 }
 0x132   : > { %3443 = vmatprep.mubr.msk.bf16.mxu0 %vm1575_vm3, %v3560_v9 }
 0x134   : > { %3410 = vmatmul.mubr.msk.bf16.gmra.mxu1 %vm1575_vm3, %v3561_v1 }
 0x135   : > { %3413 = vmatprep.mubr.msk.bf16.mxu1 %vm1575_vm3, %v3562_v34 }
 0x139   : > { %3444 = vmatmul.mubr.msk.bf16.gmra.mxu0 %vm1575_vm3, %v3563_v35 }
 0x13a   : > { %3447 = vmatprep.mubr.msk.bf16.mxu0 %vm1575_vm3, %v3564_v37 }
 0x13c   : > { %3414 = vmatmul.mubr.msk.bf16.gmra.mxu1 %vm1575_vm3, %v3565_v38 }
 0x13d   : > { %3417 = vmatprep.mubr.msk.bf16.mxu1 %vm1575_vm3, %v3566_v39 }
 0x141   : > { %3448 = vmatmul.mubr.msk.bf16.gmra.mxu0 %vm1575_vm3, %v3567_v40 }
 0x142   : > { %3451 = vmatprep.mubr.msk.bf16.mxu0 %vm1575_vm3, %v3568_v36 }
 0x144   : > { %3418 = vmatmul.mubr.msk.bf16.gmra.mxu1 %vm1575_vm3, %v3569_v41 }
 0x145   : > { %3421 = vmatprep.mubr.msk.bf16.mxu1 %vm1575_vm3, %v3570_v42 }
 0x149   : > { %3452 = vmatmul.mubr.msk.bf16.gmra.mxu0 %vm1575_vm3, %v3571_v43 }
 0x14a   : > { %3455 = vmatprep.mubr.msk.bf16.mxu0 %vm1575_vm3, %v3572_v44 }
 0x14c   : > { %3422 = vmatmul.mubr.msk.bf16.gmra.mxu1 %vm1575_vm3, %v3573_v45 }
 0x151   : > { %3456 = vmatmul.mubr.msk.bf16.gmra.mxu0 %vm1575_vm3, %v3574_v53 }
 0x17c   : > { %v4512_v46 = vpop.f32.mrf.mxu1 }
 0x17e   : > { %v4514_v47 = vpop.f32.mrf.mxu1 }
 0x180   : > { %v4516_v50 = vpop.f32.mrf.mxu1 }
 0x181   : > { %v3361_v48 = vpop.f32.mrf.mxu0 }
 0x182   : > { %v4518_v51 = vpop.f32.mrf.mxu1 }
 0x183   : > { %v1662_v15 = vpop.f32.mrf.mxu0 }
 0x185   : > { %v3362_v52 = vpop.f32.mrf.mxu0 }
 0x187   : > { %v1665_v54 = vpop.f32.mrf.mxu0 }
 0x19c   : > { %v4520_v29 = vpop.f32.mrf.mxu1 }
 0x19e   : > { %v4522_v55 = vpop.f32.mrf.mxu1 }
 0x1a0   : > { %v4524_v56 = vpop.f32.mrf.mxu1 }
 0x1a1   : > { %v3365_v6 = vpop.f32.mrf.mxu0 }
 0x1a2   : > { %v4526_v33 = vpop.f32.mrf.mxu1 }
 0x1a3   : > { %v1678_v58 = vpop.f32.mrf.mxu0 }
 0x1a5   : > { %v3366_v59 = vpop.f32.mrf.mxu0 }
 0x1a7   : > { %v1681_v61 = vpop.f32.mrf.mxu0 }
 0x1bc   : > { %v4528_v60 = vpop.f32.mrf.mxu1 }
 0x1be   : > { %v4530_v0 = vpop.f32.mrf.mxu1 }
 0x1c0   : > { %v4534_v3 = vpop.f32.mrf.mxu1 }
 0x1c1   : > { %v4532_v2 = vpop.f32.mrf.mxu0 }
 0x1c2   : > { %v4538_v4 = vpop.f32.mrf.mxu1 }
 0x1c3   : > { %v4536_v22 = vpop.f32.mrf.mxu0 }
 0x1c5   : > { %v4540_v5 = vpop.f32.mrf.mxu0 }
 0x1c7   : > { %v4544_v62 = vpop.f32.mrf.mxu0 }
 0x1cc   : > { %v4542_v7 = vpop.f32.mrf.mxu1 }
 0x1ce   : > { %v4546_v49 = vpop.f32.mrf.mxu1 }
 0x1d0   : > { %v4548_v8 = vpop.f32.mrf.mxu1 }
 0x1d1   : > { %v4550_v11 = vpop.f32.mrf.mxu0 }
 0x1d2   : > { %v4552_v57 = vpop.f32.mrf.mxu1 }
 0x1d3   : > { %v4554_v12 = vpop.f32.mrf.mxu0 }
 0x1d4   : > { %v3395_v13 = vpop.f32.mrf.mxu1 }
 0x1d5   : > { %v4556_v23 = vpop.f32.mrf.mxu0  ;;  %v1968_v25 = vadd.f32 %v3395_v13, %v3361_v48 }
 0x1d6   : > { %v1959_v16 = vpop.f32.mrf.mxu1 }
 0x1d7   : > { %v4558_v17 = vpop.f32.mrf.mxu0  ;;  %v1960_v21 = vadd.f32 %v1959_v16, %v1662_v15 }
 0x1d8   : > { %v3396_v18 = vpop.f32.mrf.mxu1 }
 0x1d9   : > { %v3429_v20 = vpop.f32.mrf.mxu0  ;;  %v1971_v28 = vadd.f32 %v3396_v18, %v3362_v52 }
 0x1da   : > { %v2424_v24 = vadd.f32 %v3429_v20, %v1968_v25  ;;  %v1962_v26 = vpop.f32.mrf.mxu1 }
 0x1db   : > { %v2295_v27 = vpop.f32.mrf.mxu0  ;;  %v1963_v1 = vadd.f32 %v1962_v26, %v1665_v54 }
 0x1dc   : > { %v4566_v30 = vadd.f32 %v4563_v19, %v2424_v24  ;;  %v2422_v31 = vadd.f32 %v2295_v27, %v1960_v21  ;;  %v3399_v32 = vpop.f32.mrf.mxu1 }
 0x1dd   : > { %v3430_v10 = vpop.f32.mrf.mxu0  ;;  %v1984_v38 = vadd.f32 %v3399_v32, %v3365_v6 }
 0x1de   : > { %v3110_v14 = vmul.f32 -1.442695, %v4566_v30  ;;  %v4570_v63 = vadd.f32 %v4563_v19, %v2422_v31  ;;  %v2425_v9 = vadd.f32 %v3430_v10, %v1971_v28  ;;  %v1975_v34 = vpop.f32.mrf.mxu1 }
 0x1df   : > { %v2298_v35 = vpop.f32.mrf.mxu0  ;;  %v1976_v43 = vadd.f32 %v1975_v34, %v1678_v58 }
 0x1e0   : > { %3575 = vpow2.f32 %v3110_v14  ;;  %v3108_v37 = vmul.f32 -1.442695, %v4570_v63  ;;  %v4574_v39 = vadd.f32 %v4563_v19, %v2425_v9  ;;  %v2423_v40 = vadd.f32 %v2298_v35, %v1963_v1  ;;  %v3400_v36 = vpop.f32.mrf.mxu1 }
 0x1e1   : > { %v3433_v41 = vpop.f32.mrf.mxu0  ;;  %v1987_v15 = vadd.f32 %v3400_v36, %v3366_v59 }
 0x1e2   : > { %3577 = vpow2.f32 %v3108_v37  ;;  %v3111_v42 = vmul.f32 -1.442695, %v4574_v39  ;;  %v2428_v44 = vadd.f32 %v3433_v41, %v1984_v38  ;;  %v4578_v45 = vadd.f32 %v4563_v19, %v2423_v40  ;;  %v1978_v53 = vpop.f32.mrf.mxu1 }
 0x1e3   : > { %v2311_v48 = vpop.f32.mrf.mxu0  ;;  %v1979_v20 = vadd.f32 %v1978_v53, %v1681_v61 }
 0x1e4   : > { %3579 = vpow2.f32 %v3111_v42  ;;  %v4581_v52 = vadd.f32 %v4563_v19, %v2428_v44  ;;  %v2426_v54 = vadd.f32 %v2311_v48, %v1976_v43  ;;  %v3109_v6 = vmul.f32 -1.442695, %v4578_v45  ;;  %v3403_v13 = vpop.f32.mrf.mxu1 }
 0x1e5   : > { %v3434_v16 = vpop.f32.mrf.mxu0  ;;  %v2000_v26 = vadd.f32 %v3403_v13, %v4532_v2 }
 0x1e6   : > { %v3114_v25 = vmul.f32 -1.442695, %v4581_v52  ;;  %v4586_v58 = vadd.f32 %v4563_v19, %v2426_v54  ;;  %v2429_v18 = vadd.f32 %v3434_v16, %v1987_v15  ;;  %3581 = vpow2.f32 %v3109_v6  ;;  %v1991_v21 = vpop.f32.mrf.mxu1 }
 0x1e7   : > { %v2314_v24 = vpop.f32.mrf.mxu0  ;;  %v1992_v14 = vadd.f32 %v1991_v21, %v4536_v22 }
 0x1e8   : > { %3583 = vpow2.f32 %v3114_v25  ;;  %v3112_v59 = vmul.f32 -1.442695, %v4586_v58  ;;  %v4591_v27 = vadd.f32 %v4563_v19, %v2429_v18  ;;  %v2427_v28 = vadd.f32 %v2314_v24, %v1979_v20  ;;  %v3404_v31 = vpop.f32.mrf.mxu1 }
 0x1e9   : > { %v3437_v32 = vpop.f32.mrf.mxu0  ;;  %v2003_v40 = vadd.f32 %v3404_v31, %v4540_v5 }
 0x1ea   : > { %3585 = vpow2.f32 %v3112_v59  ;;  %v3115_v10 = vmul.f32 -1.442695, %v4591_v27  ;;  %v2432_v9 = vadd.f32 %v3437_v32, %v2000_v26  ;;  %v4596_v61 = vadd.f32 %v4563_v19, %v2427_v28  ;;  %v1994_v1 = vpop.f32.mrf.mxu1 }
 0x1eb   : > { %v2327_v34 = vpop.f32.mrf.mxu0  ;;  %v1995_v53 = vadd.f32 %v1994_v1, %v4544_v62 }
 0x1ec   : > { %3587 = vpow2.f32 %v3115_v10  ;;  %v4599_v2 = vadd.f32 %v4563_v19, %v2432_v9  ;;  %v2430_v35 = vadd.f32 %v2327_v34, %v1992_v14  ;;  %v3113_v38 = vmul.f32 -1.442695, %v4596_v61  ;;  %v3407_v36 = vpop.f32.mrf.mxu1 }
 0x1ed   : > { %v3576_v37 = vpop.eup %3575  ;;  %v3438_v41 = vpop.f32.mrf.mxu0  ;;  %v2016_v5 = vadd.f32 %v3407_v36, %v4550_v11 }
 0x1ee   : > { %v2590_v42 = vadd.f32 1.0, %v3576_v37  ;;  %v3118_v22 = vmul.f32 -1.442695, %v4599_v2  ;;  %v4605_v43 = vadd.f32 %v4563_v19, %v2430_v35  ;;  %3589 = vpow2.f32 %v3113_v38  ;;  %v2007_v15 = vpop.f32.mrf.mxu1 }
 0x1ef   : > { %v3578_v44 = vpop.eup %3577  ;;  %v2433_v48 = vadd.f32 %v3438_v41, %v2003_v40  ;;  %v2330_v54 = vpop.f32.mrf.mxu0  ;;  %v2008_v62 = vadd.f32 %v2007_v15, %v4554_v12 }
 0x1f0   : > { %3591 = vrcp.f32 %v2590_v42  ;;  %v2588_v6 = vadd.f32 1.0, %v3578_v44  ;;  %v3116_v13 = vmul.f32 -1.442695, %v4605_v43  ;;  %v2431_v18 = vadd.f32 %v2330_v54, %v1995_v53  ;;  %v3408_v20 = vpop.f32.mrf.mxu1 }
 0x1f1   : > { %v3580_v16 = vpop.eup %3579  ;;  %3593 = vpow2.f32 %v3118_v22  ;;  %v4611_v25 = vadd.f32 %v4563_v19, %v2433_v48  ;;  %v3441_v21 = vpop.f32.mrf.mxu0  ;;  %v2019_v34 = vadd.f32 %v3408_v20, %v4556_v23 }
 0x1f2   : > { %3595 = vrcp.f32 %v2588_v6  ;;  %v2591_v24 = vadd.f32 1.0, %v3580_v16  ;;  %v2436_v59 = vadd.f32 %v3441_v21, %v2016_v5  ;;  %v4616_v28 = vadd.f32 %v4563_v19, %v2431_v18  ;;  %v2010_v11 = vpop.f32.mrf.mxu1 }
 0x1f3   : > { %3597 = vpow2.f32 %v3116_v13  ;;  %v3119_v26 = vmul.f32 -1.442695, %v4611_v25  ;;  %v2343_v31 = vpop.f32.mrf.mxu0  ;;  %v3582_v32 = vpop.eup %3581  ;;  %v2011_v42 = vadd.f32 %v2010_v11, %v4558_v17 }
 0x1f4   : > { %3599 = vrcp.f32 %v2591_v24  ;;  %v4619_v10 = vadd.f32 %v4563_v19, %v2436_v59  ;;  %v2434_v14 = vadd.f32 %v2343_v31, %v2008_v62  ;;  %v2589_v1 = vadd.f32 1.0, %v3582_v32  ;;  %v3411_v35 = vpop.f32.mrf.mxu1 }
 0x1f5   : > { %v3584_v9 = vpop.eup %3583  ;;  %3601 = vpow2.f32 %v3119_v26  ;;  %v3117_v12 = vmul.f32 -1.442695, %v4616_v28  ;;  %v3442_v37 = vpop.f32.mrf.mxu0  ;;  %v2032_v15 = vadd.f32 %v3411_v35, %v4512_v46 }
 0x1f6   : > { %v2594_v38 = vadd.f32 1.0, %v3584_v9  ;;  %v4624_v40 = vadd.f32 %v4563_v19, %v2434_v14  ;;  %3603 = vrcp.f32 %v2589_v1  ;;  %v3122_v41 = vmul.f32 -1.442695, %v4619_v10  ;;  %v2023_v44 = vpop.f32.mrf.mxu1 }
 0x1f7   : > { %v3586_v36 = vpop.eup %3585  ;;  %v2437_v22 = vadd.f32 %v3442_v37, %v2019_v34  ;;  %v2346_v53 = vpop.f32.mrf.mxu0  ;;  %v2024_v18 = vadd.f32 %v2023_v44, %v4514_v47 }
 0x1f8   : > { %3605 = vrcp.f32 %v2594_v38  ;;  %v2592_v48 = vadd.f32 1.0, %v3586_v36  ;;  %v3120_v54 = vmul.f32 -1.442695, %v4624_v40  ;;  %v2435_v13 = vadd.f32 %v2346_v53, %v2011_v42  ;;  %v3412_v5 = vpop.f32.mrf.mxu1 }
 0x1f9   : > { %v3588_v23 = vpop.eup %3587  ;;  %3607 = vpow2.f32 %v3117_v12  ;;  %v4631_v6 = vadd.f32 %v4563_v19, %v2437_v22  ;;  %v3445_v16 = vpop.f32.mrf.mxu0  ;;  %v2035_v14 = vadd.f32 %v3412_v5, %v4516_v50 }
 0x1fa   : > { %3609 = vrcp.f32 %v2592_v48  ;;  %v2595_v17 = vadd.f32 1.0, %v3588_v23  ;;  %v2440_v20 = vadd.f32 %v3445_v16, %v2032_v15  ;;  %v4636_v46 = vadd.f32 %v4563_v19, %v2435_v13  ;;  %v2026_v24 = vpop.f32.mrf.mxu1 }
 0x1fb   : > { %3611 = vpow2.f32 %v3122_v41  ;;  %v3123_v21 = vmul.f32 -1.442695, %v4631_v6  ;;  %v2359_v62 = vpop.f32.mrf.mxu0  ;;  %v3590_v59 = vpop.eup %3589  ;;  %v2027_v36 = vadd.f32 %v2026_v24, %v4518_v51 }
 0x1fc   : > { %3613 = vrcp.f32 %v2595_v17  ;;  %v4639_v26 = vadd.f32 %v4563_v19, %v2440_v20  ;;  %v2438_v11 = vadd.f32 %v2359_v62, %v2024_v18  ;;  %v2593_v32 = vadd.f32 1.0, %v3590_v59  ;;  %v3415_v9 = vpop.f32.mrf.mxu1 }
 0x1fd   : > { %v3592_v31 = vpop.eup %3591  ;;  %3615 = vpow2.f32 %v3120_v54  ;;  %v3121_v47 = vmul.f32 -1.442695, %v4636_v46  ;;  %v3446_v1 = vpop.f32.mrf.mxu0  ;;  %v2048_v48 = vadd.f32 %v3415_v9, %v4520_v29 }
 0x1fe   : > { %v3594_v12 = vpop.eup %3593  ;;  %3617 = vpow2.f32 %v3123_v21  ;;  %v3126_v34 = vmul.f32 -1.442695, %v4639_v26  ;;  %v4646_v35 = vadd.f32 %v4563_v19, %v2438_v11  ;;  %v2441_v41 = vadd.f32 %v3446_v1, %v2035_v14  ;;  %v2039_v42 = vpop.f32.mrf.mxu1 }
 0x1ff   : > { %v3596_v37 = vpop.eup %3595  ;;  %3619 = vrcp.f32 %v2593_v32  ;;  %v2598_v38 = vadd.f32 1.0, %v3594_v12  ;;  %v2362_v22 = vpop.f32.mrf.mxu0  ;;  %v2686_v50 = vmul.f32 %v3592_v31, %v4566_v30  ;;  %v2040_v17 = vadd.f32 %v2039_v42, %v4522_v55 }
 0x200   : > { %v3598_v44 = vpop.eup %3597  ;;  %3621 = vpow2.f32 %v3121_v47  ;;  %v3124_v53 = vmul.f32 -1.442695, %v4646_v35  ;;  %v4657_v54 = vadd.f32 %v4563_v19, %v2441_v41  ;;  %v2439_v51 = vadd.f32 %v2362_v22, %v2027_v36  ;;  %v3416_v13 = vpop.f32.mrf.mxu1 }
 0x201   : > { %v3600_v15 = vpop.eup %3599  ;;  %3623 = vrcp.f32 %v2598_v38  ;;  %v2596_v23 = vadd.f32 1.0, %v3598_v44  ;;  %v3449_v5 = vpop.f32.mrf.mxu0  ;;  %v2684_v11 = vmul.f32 %v3596_v37, %v4570_v63  ;;  %v2051_v63 = vadd.f32 %v3416_v13, %v4524_v56 }
 0x202   : > { %v3602_v16 = vpop.eup %3601  ;;  %v2687_v30 = vmul.f32 %v3600_v15, %v4574_v39  ;;  %3625 = vpow2.f32 %v3126_v34  ;;  %v2444_v18 = vadd.f32 %v3449_v5, %v2048_v48  ;;  %v3127_v29 = vmul.f32 -1.442695, %v4657_v54  ;;  %v2042_v24 = vpop.f32.mrf.mxu1 }
 0x203   : > { %3627 = vrcp.f32 %v2596_v23  ;;  %v2599_v20 = vadd.f32 1.0, %v3602_v16  ;;  %v4663_v21 = vadd.f32 %v4563_v19, %v2439_v51  ;;  %v2375_v62 = vpop.f32.mrf.mxu0  ;;  %v3604_v59 = vpop.eup %3603  ;;  %v2043_v37 = vadd.f32 %v2042_v24, %v4526_v33 }
 0x204   : > { %v3219_v31 = vpack.c.bf16 %v2687_v30, %v2686_v50  ;;  %3629 = vpow2.f32 %v3124_v53  ;;  %v4667_v39 = vadd.f32 %v4563_v19, %v2444_v18  ;;  %v2685_v32 = vmul.f32 %v3604_v59, %v4578_v45  ;;  %v3419_v9 = vpop.f32.mrf.mxu1 }
 0x205   : > { %v3606_v55 = vpop.eup %3605  ;;  %3631 = vrcp.f32 %v2599_v20  ;;  %v3125_v47 = vmul.f32 -1.442695, %v4663_v21  ;;  %v2442_v14 = vadd.f32 %v2375_v62, %v2040_v17  ;;  %v3450_v1 = vpop.f32.mrf.mxu0  ;;  %v2064_v56 = vadd.f32 %v3419_v9, %v4528_v60 }
 0x206   : > { %v3608_v12 = vpop.eup %3607  ;;  %3291 = vst [vmem:[%s4672_s26 + $0x8] sm:$0xff] %v3219_v31   ;;  %3633 = vpow2.f32 %v3127_v29  ;;  %v3130_v34 = vmul.f32 -1.442695, %v4667_v39  ;;  %v3214_v38 = vpack.c.bf16 %v2685_v32, %v2684_v11  ;;  %v2055_v42 = vpop.f32.mrf.mxu1  ;;  %v2690_v50 = vmul.f32 %v3606_v55, %v4581_v52 }
 0x207   : > { %v3610_v45 = vpop.eup %3609  ;;  %v2597_v36 = vadd.f32 1.0, %v3608_v12  ;;  %3635 = vpow2.f32 %v3125_v47  ;;  %v4679_v41 = vadd.f32 %v4563_v19, %v2442_v14  ;;  %v2378_v22 = vpop.f32.mrf.mxu0  ;;  %v2445_v53 = vadd.f32 %v3450_v1, %v2051_v63 }
 0x208   : > { %v3612_v44 = vpop.eup %3611  ;;  %3637 = vpow2.f32 %v3130_v34  ;;  %3215 = vst [vmem:[%s4672_s26] sm:$0xff] %v3214_v38   ;;  %v2443_v23 = vadd.f32 %v2378_v22, %v2043_v37  ;;  %v3420_v51 = vpop.f32.mrf.mxu1  ;;  %v2688_v16 = vmul.f32 %v3610_v45, %v4586_v58  ;;  %v2056_v20 = vadd.f32 %v2055_v42, %v4530_v0 }
 0x209   : > { %v3614_v48 = vpop.eup %3613  ;;  %3639 = vrcp.f32 %v2597_v36  ;;  %v2602_v33 = vadd.f32 1.0, %v3612_v44  ;;  %v3128_v15 = vmul.f32 -1.442695, %v4679_v41  ;;  %v3453_v13 = vpop.f32.mrf.mxu0  ;;  %v4688_v52 = vadd.f32 %v4563_v19, %v2445_v53 }
 0x20a   : > { %v3616_v5 = vpop.eup %3615  ;;  %v2691_v30 = vmul.f32 %v3614_v48, %v4591_v27  ;;  %v2448_v17 = vadd.f32 %v3453_v13, %v2064_v56  ;;  %v4692_v29 = vadd.f32 %v4563_v19, %v2443_v23  ;;  %v2058_v24 = vpop.f32.mrf.mxu1  ;;  %v2067_v12 = vadd.f32 %v3420_v51, %v4534_v3 }
 0x20b   : > { %v3618_v60 = vpop.eup %3617  ;;  %3641 = vrcp.f32 %v2602_v33  ;;  %v2600_v18 = vadd.f32 1.0, %v3616_v5  ;;  %v2391_v62 = vpop.f32.mrf.mxu0  ;;  %v3131_v27 = vmul.f32 -1.442695, %v4688_v52  ;;  %v2059_v45 = vadd.f32 %v2058_v24, %v4538_v4 }
 0x20c   : > { %v3620_v59 = vpop.eup %3619  ;;  %v3229_v11 = vpack.c.bf16 %v2691_v30, %v2690_v50  ;;  %v2603_v58 = vadd.f32 1.0, %v3618_v60  ;;  %3643 = vpow2.f32 %v3128_v15  ;;  %v3129_v32 = vmul.f32 -1.442695, %v4692_v29  ;;  %v3423_v47 = vpop.f32.mrf.mxu1 }
 0x20d   : > { %v3622_v31 = vpop.eup %3621  ;;  %v2689_v55 = vmul.f32 %v3620_v59, %v4596_v61  ;;  %3645 = vrcp.f32 %v2600_v18  ;;  %v4698_v0 = vadd.f32 %v4563_v19, %v2448_v17  ;;  %v3454_v14 = vpop.f32.mrf.mxu0  ;;  %v2446_v63 = vadd.f32 %v2391_v62, %v2056_v20 }
 0x20e   : > { %v3624_v9 = vpop.eup %3623  ;;  %3293 = vst [vmem:[%s4672_s26 + $0x18] sm:$0xff] %v3229_v11   ;;  %3647 = vrcp.f32 %v2603_v58  ;;  %v2601_v1 = vadd.f32 1.0, %v3622_v31  ;;  %v2071_v38 = vpop.f32.mrf.mxu1  ;;  %v2080_v3 = vadd.f32 %v3423_v47, %v4542_v7  ;;  %v2449_v53 = vadd.f32 %v3454_v14, %v2067_v12 }
 0x20f   : > { %v3626_v34 = vpop.eup %3625  ;;  %v3224_v37 = vpack.c.bf16 %v2689_v55, %v2688_v16  ;;  %3649 = vpow2.f32 %v3131_v27  ;;  %v3134_v61 = vmul.f32 -1.442695, %v4698_v0  ;;  %v2394_v36 = vpop.f32.mrf.mxu0  ;;  %v2694_v22 = vmul.f32 %v3624_v9, %v4599_v2 }
 0x210   : > { %v3628_v42 = vpop.eup %3627  ;;  %3651 = vrcp.f32 %v2601_v1  ;;  %v2606_v44 = vadd.f32 1.0, %v3626_v34  ;;  %v4706_v50 = vadd.f32 %v4563_v19, %v2446_v63  ;;  %v2072_v48 = vadd.f32 %v2071_v38, %v4546_v49  ;;  %v3424_v33 = vpop.f32.mrf.mxu1 }
 0x211   : > { %v3630_v56 = vpop.eup %3629  ;;  %3292 = vst [vmem:[%s4672_s26 + $0x10] sm:$0xff] %v3224_v37   ;;  %3653 = vpow2.f32 %v3129_v32  ;;  %v3457_v4 = vpop.f32.mrf.mxu0  ;;  %v2447_v51 = vadd.f32 %v2394_v36, %v2059_v45  ;;  %v4714_v16 = vadd.f32 %v4563_v19, %v2449_v53  ;;  %v2083_v7 = vadd.f32 %v3424_v33, %v4548_v8 }
 0x212   : > { %v3632_v15 = vpop.eup %3631  ;;  %3655 = vrcp.f32 %v2606_v44  ;;  %v2604_v23 = vadd.f32 1.0, %v3630_v56  ;;  %v3132_v2 = vmul.f32 -1.442695, %v4706_v50  ;;  %v2452_v18 = vadd.f32 %v3457_v4, %v2080_v3  ;;  %v2074_v59 = vpop.f32.mrf.mxu1 }
 0x213   : > { %v3634_v13 = vpop.eup %3633  ;;  %v2695_v5 = vmul.f32 %v3632_v15, %v4611_v25  ;;  %3657 = vpow2.f32 %v3134_v61  ;;  %v2407_v30 = vpop.f32.mrf.mxu0  ;;  %v4718_v60 = vadd.f32 %v4563_v19, %v2447_v51  ;;  %v3135_v25 = vmul.f32 -1.442695, %v4714_v16 }
 0x214   : > { %v3636_v17 = vpop.eup %3635  ;;  %3659 = vrcp.f32 %v2604_v23  ;;  %v2607_v49 = vadd.f32 1.0, %v3634_v13  ;;  %v4723_v31 = vadd.f32 %v4563_v19, %v2452_v18  ;;  %v2692_v55 = vmul.f32 %v3628_v42, %v4605_v43 }
 0x215   : > { %v3638_v20 = vpop.eup %3637  ;;  %v3239_v24 = vpack.c.bf16 %v2695_v5, %v2694_v22  ;;  %v2605_v62 = vadd.f32 1.0, %v3636_v17  ;;  %3661 = vpow2.f32 %v3132_v2  ;;  %v3458_v11 = vpop.f32.mrf.mxu0  ;;  %v3133_v27 = vmul.f32 -1.442695, %v4718_v60 }
 0x216   : > { %v3640_v58 = vpop.eup %3639  ;;  %3663 = vrcp.f32 %v2607_v49  ;;  %v2610_v8 = vadd.f32 1.0, %v3638_v20  ;;  %v2450_v47 = vadd.f32 %v2407_v30, %v2072_v48  ;;  %v3138_v1 = vmul.f32 -1.442695, %v4723_v31 }
 0x217   : > { %3295 = vst [vmem:[%s4672_s26 + $0x28] sm:$0xff] %v3239_v24   ;;  %v2693_v32 = vmul.f32 %v3640_v58, %v4616_v28  ;;  %3665 = vrcp.f32 %v2605_v62  ;;  %v2410_v14 = vpop.f32.mrf.mxu0  ;;  %v2075_v12 = vadd.f32 %v2074_v59, %v4552_v57  ;;  %v2453_v63 = vadd.f32 %v3458_v11, %v2083_v7 }
 0x218   : > { %v3642_v9 = vpop.eup %3641  ;;  %3667 = vrcp.f32 %v2610_v8  ;;  %v4731_v61 = vadd.f32 %v4563_v19, %v2450_v47 }
 0x219   : > { %v3644_v34 = vpop.eup %3643  ;;  %v3234_v37 = vpack.c.bf16 %v2693_v32, %v2692_v55  ;;  %3669 = vpow2.f32 %v3135_v25  ;;  %v4734_v28 = vadd.f32 %v4563_v19, %v2453_v63  ;;  %v2451_v38 = vadd.f32 %v2410_v14, %v2075_v12 }
 0x21a   : > { %v3646_v43 = vpop.eup %3645  ;;  %v2608_v45 = vadd.f32 1.0, %v3644_v34  ;;  %3671 = vpow2.f32 %v3133_v27  ;;  %v2698_v42 = vmul.f32 %v3642_v9, %v4619_v10  ;;  %v3136_v57 = vmul.f32 -1.442695, %v4731_v61 }
 0x21b   : > { %v3648_v36 = vpop.eup %3647  ;;  %3294 = vst [vmem:[%s4672_s26 + $0x20] sm:$0xff] %v3234_v37   ;;  %3673 = vpow2.f32 %v3138_v1  ;;  %v3139_v56 = vmul.f32 -1.442695, %v4734_v28  ;;  %v4742_v3 = vadd.f32 %v4563_v19, %v2451_v38  ;;  %v2696_v48 = vmul.f32 %v3646_v43, %v4624_v40 }
 0x21c   : > { %v3650_v22 = vpop.eup %3649  ;;  %v2699_v44 = vmul.f32 %v3648_v36, %v4631_v6  ;;  %3675 = vrcp.f32 %v2608_v45 }
 0x21d   : > { %v3652_v53 = vpop.eup %3651  ;;  %v2611_v33 = vadd.f32 1.0, %v3650_v22  ;;  %3677 = vpow2.f32 %v3136_v57  ;;  %v3137_v6 = vmul.f32 -1.442695, %v4742_v3 }
 0x21e   : > { %v3654_v10 = vpop.eup %3653  ;;  %v3249_v4 = vpack.c.bf16 %v2699_v44, %v2698_v42  ;;  %v2697_v15 = vmul.f32 %v3652_v53, %v4636_v46  ;;  %3679 = vpow2.f32 %v3139_v56 }
 0x21f   : > { %v3656_v23 = vpop.eup %3655  ;;  %3681 = vrcp.f32 %v2611_v33  ;;  %v2609_v2 = vadd.f32 1.0, %v3654_v10 }
 0x220   : > { %v3658_v51 = vpop.eup %3657  ;;  %3297 = vst [vmem:[%s4672_s26 + $0x38] sm:$0xff] %v3249_v4   ;;  %v3244_v19 = vpack.c.bf16 %v2697_v15, %v2696_v48  ;;  %3683 = vpow2.f32 %v3137_v6  ;;  %v2702_v46 = vmul.f32 %v3656_v23, %v4639_v26 }
 0x221   : > { %v3660_v13 = vpop.eup %3659  ;;  %3685 = vrcp.f32 %v2609_v2  ;;  %v2614_v7 = vadd.f32 1.0, %v3658_v51 }
 0x222   : > { %v3662_v40 = vpop.eup %3661  ;;  %3296 = vst [vmem:[%s4672_s26 + $0x30] sm:$0xff] %v3244_v19   ;;  %v2700_v20 = vmul.f32 %v3660_v13, %v4646_v35 }
 0x223   : > { %v3664_v5 = vpop.eup %3663  ;;  %v2612_v49 = vadd.f32 1.0, %v3662_v40  ;;  %3687 = vrcp.f32 %v2614_v7 }
 0x224   : > { %v3666_v30 = vpop.eup %3665  ;;  %v2703_v17 = vmul.f32 %v3664_v5, %v4657_v54 }
 0x225   : > { %v3668_v18 = vpop.eup %3667  ;;  %v2701_v24 = vmul.f32 %v3666_v30, %v4663_v21  ;;  %3689 = vrcp.f32 %v2612_v49 }
 0x226   : > { %v3670_v62 = vpop.eup %3669  ;;  %v3259_v25 = vpack.c.bf16 %v2703_v17, %v2702_v46  ;;  %v2706_v9 = vmul.f32 %v3668_v18, %v4667_v39 }
 0x227   : > { %v3672_v59 = vpop.eup %3671  ;;  %v3254_v11 = vpack.c.bf16 %v2701_v24, %v2700_v20  ;;  %v2615_v58 = vadd.f32 1.0, %v3670_v62 }
 0x228   : > { %v3674_v8 = vpop.eup %3673  ;;  %3299 = vst [vmem:[%s4672_s26 + $0x48] sm:$0xff] %v3259_v25   ;;  %v2613_v27 = vadd.f32 1.0, %v3672_v59 }
 0x229   : > { %v3676_v26 = vpop.eup %3675  ;;  %3298 = vst [vmem:[%s4672_s26 + $0x40] sm:$0xff] %v3254_v11   ;;  %3691 = vrcp.f32 %v2615_v58  ;;  %v2618_v54 = vadd.f32 1.0, %v3674_v8 }
 0x22a   : > { %v3678_v55 = vpop.eup %3677  ;;  %3693 = vrcp.f32 %v2613_v27  ;;  %v2704_v34 = vmul.f32 %v3676_v26, %v4679_v41 }
 0x22b   : > { %v3680_v32 = vpop.eup %3679  ;;  %v2616_v35 = vadd.f32 1.0, %v3678_v55  ;;  %3695 = vrcp.f32 %v2618_v54 }
 0x22c   : > { %v3682_v21 = vpop.eup %3681  ;;  %v2619_v47 = vadd.f32 1.0, %v3680_v32 }
 0x22d   : > { %v3684_v14 = vpop.eup %3683  ;;  %v2707_v1 = vmul.f32 %v3682_v21, %v4688_v52  ;;  %3697 = vrcp.f32 %v2616_v35 }
 0x22e   : > { %v3686_v12 = vpop.eup %3685  ;;  %3699 = vrcp.f32 %v2619_v47  ;;  %v2617_v63 = vadd.f32 1.0, %v3684_v14 }
 0x22f   : > { %v3269_v37 = vpack.c.bf16 %v2707_v1, %v2706_v9  ;;  %v2705_v43 = vmul.f32 %v3686_v12, %v4692_v29 }
 0x230   : > { %3701 = vrcp.f32 %v2617_v63  ;;  %v3688_v38 = vpop.eup %3687 }
 0x231   : > { %3301 = vst [vmem:[%s4672_s26 + $0x58] sm:$0xff] %v3269_v37   ;;  %v3264_v45 = vpack.c.bf16 %v2705_v43, %v2704_v34  ;;  %v2710_v42 = vmul.f32 %v3688_v38, %v4698_v0 }
 0x232   : > { %v3690_v36 = vpop.eup %3689 }
 0x233   : > { %3300 = vst [vmem:[%s4672_s26 + $0x50] sm:$0xff] %v3264_v45   ;;  %v2708_v41 = vmul.f32 %v3690_v36, %v4706_v50 }
 0x236   : > { %v3692_v39 = vpop.eup %3691 }
 0x237   : > { %v3694_v52 = vpop.eup %3693  ;;  %v2711_v57 = vmul.f32 %v3692_v39, %v4714_v16 }
 0x238   : > { %v2709_v29 = vmul.f32 %v3694_v52, %v4718_v60  ;;  %v3696_v22 = vpop.eup %3695 }
 0x239   : > { %v3279_v44 = vpack.c.bf16 %v2711_v57, %v2710_v42  ;;  %v2714_v33 = vmul.f32 %v3696_v22, %v4723_v31 }
 0x23a   : > { %v3698_v56 = vpop.eup %3697  ;;  %v3274_v53 = vpack.c.bf16 %v2709_v29, %v2708_v41 }
 0x23b   : > { %v3700_v48 = vpop.eup %3699  ;;  %3303 = vst [vmem:[%s4672_s26 + $0x68] sm:$0xff] %v3279_v44   ;;  %v2712_v50 = vmul.f32 %v3698_v56, %v4731_v61 }
 0x23c   : > { %3302 = vst [vmem:[%s4672_s26 + $0x60] sm:$0xff] %v3274_v53   ;;  %v2715_v0 = vmul.f32 %v3700_v48, %v4734_v28 }
 0x23d   : > { %v3702_v16 = vpop.eup %3701 }
 0x23e   : > { %v3289_v60 = vpack.c.bf16 %v2715_v0, %v2714_v33  ;;  %v2713_v10 = vmul.f32 %v3702_v16, %v4742_v3 }
 0x240   : > { %3305 = vst [vmem:[%s4672_s26 + $0x78] sm:$0xff] %v3289_v60   ;;  %v3284_v4 = vpack.c.bf16 %v2713_v10, %v2712_v50 }
 0x242   : > { %3304 = vst [vmem:[%s4672_s26 + $0x70] sm:$0xff] %v3284_v4  }
 0x243   : > { %3716 = shalt.err (!%p3713_p5)
}
 0x244   : > { %s3717_s10 = scalar_lea.hbm %s4776_s5, 2048  ;;  %s3721_s19 = scalar_lea.hbm %s4833_s3, 4096 }
 0x245   : > { %p3718_p6 = scmp.ne.s32.totalorder %s4776_s5, %s3717_s10  ;;  %p3722_p10 = scmp.lt.s32.totalorder %s4776_s5, %s4833_s3 }
 0x246   : > { %p3723_p11 = scmp.lt.s32.totalorder %s3721_s19, %s3717_s10 }
 0x247   : > { %p3719_p7 = pnand %p3718_p6, %p3846_p4 }
 0x248   : > { %p3724_p12 = por %p3723_p11, %p3722_p10 }
 0x249   : > { %p3720_p9 = pneg %p3719_p7 }
 0x24b   : > { %p3725_p13 = pnand %p3724_p12, %p3720_p9 }
 0x24d   : > { %3728 = shalt.err (!%p3725_p13)
}
 0x24e   : > { %s3785_s26 = smov 64  }
 0x24f   : > { %3465 = dma.vmem_to_hbm [thread:$0]  (%p3846_p4), %s4779_s28, 2048, %s4776_s5, %s4784_s15, %s3785_s26, %s3785_s26, %s3781_s4  }
 0x250 PF: > { %p3471_p0 = scmp.ge.s32.totalorder %s3779_s17, 2  ;;  %s2908_s27 = sand.u32 1, %s3759_s12  }
 0x251   : > { %s2909_s29 = scalar_lea.sflag [#allocation4], %s2908_s27 }
 0x252   : > { %p3468_p1 = pnand %p3471_p0, %p3853_p8 }
 0x254   : > { %p3469_p2 = pneg %p3468_p1 }
 0x256   : > { %3754 = dma.done.wait (%p3469_p2), %s2909_s29, 2048  }
 0x257   : > { %3756 = vsyncadd (%p3469_p2), %s2909_s29, 4294965248  ;;  %s16_s17 = sadd.s32 1, %s3779_s17   ;;  %s4848_s12 = smov %s3763_s13 }
 0x258   : > { %p13_p3 = scmp.ge.s32.totalorder %s16_s17, 4   ;;  %s4849_s13 = smov %s3767_s14 }
 0x259   : > { %s4850_s14 = smov %s3859_s25  ;;  %s4851_s15 = smov %s3775_s16 }
 0x25a   : > { %s4852_s16 = smov %s4854_s20  ;;  %15 = sbr.rel (!%p13_p3) target bundleno = 4 (0x4), region = 85 }
 0x25f   :  { %2914 = vsyncpa [#allocation4], 1 }
 0x260   :  { %2916 = vsyncpa [#allocation4 + $0x1], 1 }

</bundles_post_ra>
